<compile_context>
chip_gen: v7x
topology: tpu7x:2x2x1
jax: 0.10.0
libtpu: 0.0.40
codegen_flags: <defaults>
</compile_context>

<pallas_src>
import functools

import jax
import jax.numpy as jnp
from jax.experimental import pallas as pl
from jax.experimental.pallas import tpu as pltpu


def _round_up(x, m):
    return ((x + m - 1) // m) * m


def _lplayer3_kernel(neg_slope,
                     s_ref, b_ref, h0_ref, h2_ref, r_ref, a0_ref, cf_ref,
                     o_ref, num_acc, den_acc):
    e_step = pl.program_id(1)
    n_nodes = num_acc.shape[0]

    @pl.when(e_step == 0)
    def _init():
        num_acc[...] = jnp.zeros_like(num_acc)
        den_acc[...] = jnp.zeros_like(den_acc)

    s = s_ref[...]                        # (1, d)   per-head diagonal scale
    x0 = h0_ref[...] * s                  # (te, d)  h_i[A0]
    x2 = h2_ref[...] * s                  # (te, d)  h_i[A2]
    r = r_ref[...]                        # (te, d)  inputr[A1]  (never scaled)

    diff = x0 + r - x2
    nrm = jnp.sqrt(jnp.sum(diff * diff, axis=-1, keepdims=True))      # (te, 1)
    z = nrm * cf_ref[...]                                             # (te, 1)
    z = jnp.where(z >= 0, z, neg_slope * z)                           # leaky_relu(0.2)
    a_e = jnp.exp(-z)                                                 # (te, 1)  EUP

    msg = (x2 - r) * a_e                                              # (te, d)

    # Scatter-add over destination nodes as a one-hot matmul on the MXU.
    te, d = msg.shape
    oh = (jax.lax.broadcasted_iota(jnp.int32, (n_nodes, te), 0)
          == a0_ref[...]).astype(msg.dtype)                           # (N, te)
    num_acc[...] += jnp.dot(oh, msg, preferred_element_type=jnp.float32)
    den_acc[...] += jnp.dot(oh, jnp.broadcast_to(a_e, (te, d)),
                            preferred_element_type=jnp.float32)       # rowsum, lane-replicated

    @pl.when(e_step == pl.num_programs(1) - 1)
    def _finalize():
        out = num_acc[...] / den_acc[...] + b_ref[...].astype(jnp.float32)
        o_ref[...] = out.astype(o_ref.dtype)


def lplayer3_forward(h, inputr, A, cfdc, w=None, bias=None, *,
                     n_head, diag=True, neg_slope=0.2, edge_tile=512):
    """Pallas TPU implementation of LPlayer3.forward (diag=True path).

    h: [N, d] entity features; inputr: [R, d] relation features;
    A: [3, E] int (A[0]=dst, A[1]=relation, A[2]=src); cfdc: [E] edge confidences;
    w: [n_head-1, 1, d] diagonal head scales; bias: [d] or None. Returns [n_head, N, d].

    NOTE: the [N, d] per-head output (and its f32 accumulators) stays resident in VMEM;
    for very large graphs (N*d*4B approaching the 32 MiB scoped / 64 MiB v7x budget) the
    node dim would additionally need tiling with destination-sorted edge blocks.
    """
    assert diag, "TODO(synk): non-diag (Householder w_ori) path not implemented in Pallas"
    N, d = h.shape
    E = A.shape[1]
    dtype = h.dtype

    # Per-head cumulative diagonal scales: heads 0,1 unscaled (LPlayer3 scales from i>=2).
    scales = [jnp.ones((d,), dtype) for _ in range(min(n_head, 2))]
    cur = jnp.ones((d,), dtype)
    for i in range(2, n_head):
        cur = cur * w[i - 1, 0].astype(dtype)
        scales.append(cur)
    S = jnp.stack(scales, axis=0).reshape(n_head, 1, d)

    b2d = jnp.zeros((1, d), dtype) if bias is None else bias.reshape(1, d).astype(dtype)

    # Head-independent edge gathers (plain XLA gather); streamed through the pipelined grid.
    a0 = A[0].astype(jnp.int32)
    hA0 = jnp.take(h, a0, axis=0)                              # (E, d)
    hA2 = jnp.take(h, A[2].astype(jnp.int32), axis=0)          # (E, d)
    rA1 = jnp.take(inputr, A[1].astype(jnp.int32), axis=0)     # (E, d)
    cf = cfdc.astype(jnp.float32)

    # Lane/sublane-aligned edge tile; pad E up to a multiple of it. Padded edges point at
    # destination N (out of range) so their one-hot column is all zero -> no contribution.
    edge_tile = max(128, _round_up(min(edge_tile, max(E, 1)), 128))
    Ep = _round_up(E, edge_tile)
    pad = Ep - E
    if pad:
        hA0 = jnp.pad(hA0, ((0, pad), (0, 0)))
        hA2 = jnp.pad(hA2, ((0, pad), (0, 0)))
        rA1 = jnp.pad(rA1, ((0, pad), (0, 0)))
        a0 = jnp.pad(a0, (0, pad), constant_values=N)
        cf = jnp.pad(cf, (0, pad))
    a0_lane = a0.reshape(1, Ep)        # lanes = edges: one-hot is built directly as (N, te)
    cf_col = cf.reshape(Ep, 1)         # sublanes = edges: matches the (te, 1) norm layout

    grid = (n_head, Ep // edge_tile)
    kernel = functools.partial(_lplayer3_kernel, neg_slope)

    return pl.pallas_call(
        kernel,
        out_shape=jax.ShapeDtypeStruct((n_head, N, d), dtype),
        grid_spec=pltpu.PrefetchScalarGridSpec(
            num_scalar_prefetch=0,
            grid=grid,
            in_specs=[
                pl.BlockSpec((None, 1, d), lambda i, e: (i, 0, 0)),    # per-head scale
                pl.BlockSpec((1, d), lambda i, e: (0, 0)),             # bias (resident)
                pl.BlockSpec((edge_tile, d), lambda i, e: (e, 0)),     # h[A0] edge tile
                pl.BlockSpec((edge_tile, d), lambda i, e: (e, 0)),     # h[A2] edge tile
                pl.BlockSpec((edge_tile, d), lambda i, e: (e, 0)),     # inputr[A1] edge tile
                pl.BlockSpec((1, edge_tile), lambda i, e: (0, e)),     # A0 dst ids (lane layout)
                pl.BlockSpec((edge_tile, 1), lambda i, e: (e, 0)),     # cfdc (sublane layout)
            ],
            out_specs=pl.BlockSpec((None, N, d), lambda i, e: (i, 0, 0)),
            scratch_shapes=[
                pltpu.VMEM((N, d), jnp.float32),   # numerator accumulator
                pltpu.VMEM((N, d), jnp.float32),   # denominator (rowsum, lane-replicated)
            ],
        ),
        compiler_params=pltpu.CompilerParams(
            dimension_semantics=("parallel", "arbitrary"),
        ),
    )(S, b2d, hA0, hA2, rA1, a0_lane, cf_col)


def lplayer3_ref(h, inputr, A, cfdc, w, n_head, bias=None, neg_slope=0.2):
    """Pure-JAX reference mirroring the PyTorch LPlayer3.forward (diag=True)."""
    N = h.shape[0]
    hh = h
    outs = []
    for i in range(n_head):
        if i >= 2:
            hh = hh * w[i - 1]                                   # (1, d) broadcast
        e_h = jnp.linalg.norm(hh[A[0]] + inputr[A[1]] - hh[A[2]], axis=1)
        z = e_h * cfdc
        a_e = jnp.exp(-jnp.where(z >= 0, z, neg_slope * z))
        rowsum = jax.ops.segment_sum(a_e, A[0], num_segments=N)[:, None]
        msg = (hh[A[2]] - inputr[A[1]]) * a_e[:, None]
        num = jax.ops.segment_sum(msg, A[0], num_segments=N)
        outs.append((num / rowsum)[None])
    out = jnp.concatenate(outs, axis=0)
    if bias is not None:
        out = out + bias
    return out


if __name__ == "__main__":
    key = jax.random.PRNGKey(0)
    n_head, N, R, d, E = 3, 64, 16, 128, 1024   # small graph; d multiple of 128 (lane-dense)

    keys = jax.random.split(key, 7)
    h = jax.random.normal(keys[0], (N, d), dtype=jnp.float32)
    inputr = jax.random.normal(keys[1], (R, d), dtype=jnp.float32)

    # Edge list A = [dst; rel; src]; first N edges guarantee every node has >=1 incoming edge
    # (so the rowsum normalizer is never zero, matching the layer's intended use).
    a_dst = jnp.concatenate([
        jnp.arange(N, dtype=jnp.int32),
        jax.random.randint(keys[2], (E - N,), 0, N, dtype=jnp.int32),
    ])
    a_rel = jax.random.randint(keys[3], (E,), 0, R, dtype=jnp.int32)
    a_src = jax.random.randint(keys[4], (E,), 0, N, dtype=jnp.int32)
    A = jnp.stack([a_dst, a_rel, a_src], axis=0)
    cfdc = jax.random.uniform(keys[5], (E,), dtype=jnp.float32, minval=0.01, maxval=0.1)

    # diag=True parameters: w is (n_head-1, 1, f_out); w[0] is unused by LPlayer3 (the
    # diagonal scaling only kicks in at head i>=2), matching the PyTorch module exactly.
    w = jax.random.uniform(keys[6], (n_head - 1, 1, d), dtype=jnp.float32,
                           minval=0.5, maxval=1.5)

    out = lplayer3_forward(h, inputr, A, cfdc, w, bias=None,
                           n_head=n_head, edge_tile=256)
    jax.block_until_ready(out)

    ref = lplayer3_ref(h, inputr, A, cfdc, w, n_head)
    assert out.shape == (n_head, N, d)
    max_err = jnp.max(jnp.abs(out - ref))
    assert jnp.allclose(out, ref, atol=1e-3, rtol=1e-3), f"mismatch vs reference: {max_err}"

    print("KERNEL_OK")
</pallas_src>

<mosaic_0001>
module attributes {stable_mosaic.version = 11 : i64} {
  func.func @_lplayer3_kernel(%arg0: i32, %arg1: i32, %arg2: memref<1x1x128xf32, #tpu.memory_space<vmem>>, %arg3: memref<1x128xf32, #tpu.memory_space<vmem>>, %arg4: memref<256x128xf32, #tpu.memory_space<vmem>>, %arg5: memref<256x128xf32, #tpu.memory_space<vmem>>, %arg6: memref<256x128xf32, #tpu.memory_space<vmem>>, %arg7: memref<1x256xi32, #tpu.memory_space<vmem>>, %arg8: memref<256x1xf32, #tpu.memory_space<vmem>>, %arg9: memref<1x64x128xf32, #tpu.memory_space<vmem>>, %arg10: memref<64x128xf32, #tpu.memory_space<vmem>>, %arg11: memref<64x128xf32, #tpu.memory_space<vmem>>) attributes {dimension_semantics = [#tpu.dimension_semantics<parallel>, #tpu.dimension_semantics<arbitrary>], iteration_bounds = array<i64: 3, 4>, scalar_prefetch = 0 : i64, scratch_operands = 2 : i64, tpu.core_type = #tpu.core_type<tc>, window_params = [{transform_indices = @transform_0, window_bounds = array<i64: 1, 1, 128>}, {pipeline_mode = #tpu.pipeline_mode<synchronous>, transform_indices = @transform_1, window_bounds = array<i64: 1, 128>}, {transform_indices = @transform_2, window_bounds = array<i64: 256, 128>}, {transform_indices = @transform_3, window_bounds = array<i64: 256, 128>}, {transform_indices = @transform_4, window_bounds = array<i64: 256, 128>}, {transform_indices = @transform_5, window_bounds = array<i64: 1, 256>}, {transform_indices = @transform_6, window_bounds = array<i64: 256, 1>}, {transform_indices = @transform_7, window_bounds = array<i64: 1, 64, 128>}]} {
    %c0_i32 = arith.constant 0 : i32
    %0 = arith.cmpi eq, %arg1, %c0_i32 : i32
    %1 = arith.extui %0 : i1 to i32
    %c0_i32_0 = arith.constant 0 : i32
    %2 = arith.cmpi ne, %1, %c0_i32_0 : i32
    scf.if %2 {
      %cst_27 = arith.constant 0.000000e+00 : f32
      %50 = vector.broadcast %cst_27 : f32 to vector<64x128xf32>
      %c0_28 = arith.constant 0 : index
      %c0_29 = arith.constant 0 : index
      %51 = vector.load %arg10[%c0_28, %c0_29] : memref<64x128xf32, #tpu.memory_space<vmem>>, vector<64x128xf32>
      tpu.vector_store %arg10[%c0_28, %c0_29], %50 {strides = array<i32>} : memref<64x128xf32, #tpu.memory_space<vmem>>, vector<64x128xf32>,
      %cst_30 = arith.constant 0.000000e+00 : f32
      %52 = vector.broadcast %cst_30 : f32 to vector<64x128xf32>
      %c0_31 = arith.constant 0 : index
      %c0_32 = arith.constant 0 : index
      %53 = vector.load %arg11[%c0_31, %c0_32] : memref<64x128xf32, #tpu.memory_space<vmem>>, vector<64x128xf32>
      tpu.vector_store %arg11[%c0_31, %c0_32], %52 {strides = array<i32>} : memref<64x128xf32, #tpu.memory_space<vmem>>, vector<64x128xf32>,
    } else {
    }
    %c0 = arith.constant 0 : index
    %c0_1 = arith.constant 0 : index
    %c0_2 = arith.constant 0 : index
    %3 = vector.load %arg2[%c0, %c0_1, %c0_2] : memref<1x1x128xf32, #tpu.memory_space<vmem>>, vector<1x1x128xf32>
    %4 = vector.shape_cast %3 : vector<1x1x128xf32> to vector<1x128xf32>
    %c0_3 = arith.constant 0 : index
    %c0_4 = arith.constant 0 : index
    %5 = vector.load %arg4[%c0_3, %c0_4] : memref<256x128xf32, #tpu.memory_space<vmem>>, vector<256x128xf32>
    %6 = vector.broadcast %4 : vector<1x128xf32> to vector<256x128xf32>
    %7 = arith.mulf %5, %6 : vector<256x128xf32>
    %c0_5 = arith.constant 0 : index
    %c0_6 = arith.constant 0 : index
    %8 = vector.load %arg5[%c0_5, %c0_6] : memref<256x128xf32, #tpu.memory_space<vmem>>, vector<256x128xf32>
    %9 = vector.broadcast %4 : vector<1x128xf32> to vector<256x128xf32>
    %10 = arith.mulf %8, %9 : vector<256x128xf32>
    %c0_7 = arith.constant 0 : index
    %c0_8 = arith.constant 0 : index
    %11 = vector.load %arg6[%c0_7, %c0_8] : memref<256x128xf32, #tpu.memory_space<vmem>>, vector<256x128xf32>
    %12 = arith.addf %7, %11 : vector<256x128xf32>
    %13 = arith.subf %12, %10 : vector<256x128xf32>
    %14 = arith.mulf %13, %13 : vector<256x128xf32>
    %cst = arith.constant dense<0.000000e+00> : vector<256xf32>
    %15 = vector.multi_reduction <add>, %14, %cst [1] : vector<256x128xf32> to vector<256xf32>
    %16 = vector.shape_cast %15 : vector<256xf32> to vector<256x1xf32>
    %17 = math.sqrt %16 : vector<256x1xf32>
    %c0_9 = arith.constant 0 : index
    %c0_10 = arith.constant 0 : index
    %18 = vector.load %arg8[%c0_9, %c0_10] : memref<256x1xf32, #tpu.memory_space<vmem>>, vector<256x1xf32>
    %19 = arith.mulf %17, %18 : vector<256x1xf32>
    %cst_11 = arith.constant 0.000000e+00 : f32
    %20 = vector.broadcast %cst_11 : f32 to vector<256x1xf32>
    %21 = arith.cmpf oge, %19, %20 : vector<256x1xf32>
    %cst_12 = arith.constant 2.000000e-01 : f32
    %22 = vector.broadcast %cst_12 : f32 to vector<256x1xf32>
    %23 = arith.mulf %22, %19 : vector<256x1xf32>
    %24 = arith.select %21, %19, %23 : vector<256x1xi1>, vector<256x1xf32>
    %cst_13 = arith.constant 0.000000e+00 : f32
    %25 = vector.broadcast %cst_13 : f32 to vector<256x1xf32>
    %26 = arith.subf %25, %24 : vector<256x1xf32>
    %27 = math.exp %26 : vector<256x1xf32>
    %28 = arith.subf %10, %11 : vector<256x128xf32>
    %29 = vector.broadcast %27 : vector<256x1xf32> to vector<256x128xf32>
    %30 = arith.mulf %28, %29 : vector<256x128xf32>
    %31 = tpu.iota {dimensions = array<i32: 0>} : vector<64x256xi32>
    %c0_14 = arith.constant 0 : index
    %c0_15 = arith.constant 0 : index
    %32 = vector.load %arg7[%c0_14, %c0_15] : memref<1x256xi32, #tpu.memory_space<vmem>>, vector<1x256xi32>
    %33 = vector.broadcast %32 : vector<1x256xi32> to vector<64x256xi32>
    %34 = arith.cmpi eq, %31, %33 : vector<64x256xi32>
    %35 = arith.extui %34 : vector<64x256xi1> to vector<64x256xi32>
    %36 = arith.sitofp %35 : vector<64x256xi32> to vector<64x256xf32>
    %c0_16 = arith.constant 0 : index
    %c0_17 = arith.constant 0 : index
    %37 = vector.load %arg10[%c0_16, %c0_17] : memref<64x128xf32, #tpu.memory_space<vmem>>, vector<64x128xf32>
    %cst_18 = arith.constant dense<0.000000e+00> : vector<64x128xf32>
    %38 = tpu.matmul %36, %30, %cst_18 {dimension_numbers = #tpu.dot_dimension_numbers<[1], [0], [0], [1], [0, 0, 1, 1], [], []>} : vector<64x256xf32>, vector<256x128xf32>, vector<64x128xf32> -> vector<64x128xf32>
    %39 = arith.addf %37, %38 : vector<64x128xf32>
    %c0_19 = arith.constant 0 : index
    %c0_20 = arith.constant 0 : index
    %40 = vector.load %arg10[%c0_19, %c0_20] : memref<64x128xf32, #tpu.memory_space<vmem>>, vector<64x128xf32>
    tpu.vector_store %arg10[%c0_19, %c0_20], %39 {strides = array<i32>} : memref<64x128xf32, #tpu.memory_space<vmem>>, vector<64x128xf32>,
    %c0_21 = arith.constant 0 : index
    %c0_22 = arith.constant 0 : index
    %41 = vector.load %arg11[%c0_21, %c0_22] : memref<64x128xf32, #tpu.memory_space<vmem>>, vector<64x128xf32>
    %42 = vector.shape_cast %27 : vector<256x1xf32> to vector<256x1xf32>
    %43 = vector.broadcast %42 : vector<256x1xf32> to vector<256x128xf32>
    %cst_23 = arith.constant dense<0.000000e+00> : vector<64x128xf32>
    %44 = tpu.matmul %36, %43, %cst_23 {dimension_numbers = #tpu.dot_dimension_numbers<[1], [0], [0], [1], [0, 0, 1, 1], [], []>} : vector<64x256xf32>, vector<256x128xf32>, vector<64x128xf32> -> vector<64x128xf32>
    %45 = arith.addf %41, %44 : vector<64x128xf32>
    %c0_24 = arith.constant 0 : index
    %c0_25 = arith.constant 0 : index
    %46 = vector.load %arg11[%c0_24, %c0_25] : memref<64x128xf32, #tpu.memory_space<vmem>>, vector<64x128xf32>
    tpu.vector_store %arg11[%c0_24, %c0_25], %45 {strides = array<i32>} : memref<64x128xf32, #tpu.memory_space<vmem>>, vector<64x128xf32>,
    %c3_i32 = arith.constant 3 : i32
    %47 = arith.cmpi eq, %arg1, %c3_i32 : i32
    %48 = arith.extui %47 : i1 to i32
    %c0_i32_26 = arith.constant 0 : i32
    %49 = arith.cmpi ne, %48, %c0_i32_26 : i32
    scf.if %49 {
      %c0_27 = arith.constant 0 : index
      %c0_28 = arith.constant 0 : index
      %50 = vector.load %arg10[%c0_27, %c0_28] : memref<64x128xf32, #tpu.memory_space<vmem>>, vector<64x128xf32>
      %c0_29 = arith.constant 0 : index
      %c0_30 = arith.constant 0 : index
      %51 = vector.load %arg11[%c0_29, %c0_30] : memref<64x128xf32, #tpu.memory_space<vmem>>, vector<64x128xf32>
      %52 = arith.divf %50, %51 : vector<64x128xf32>
      %c0_31 = arith.constant 0 : index
      %c0_32 = arith.constant 0 : index
      %53 = vector.load %arg3[%c0_31, %c0_32] : memref<1x128xf32, #tpu.memory_space<vmem>>, vector<1x128xf32>
      %54 = vector.broadcast %53 : vector<1x128xf32> to vector<64x128xf32>
      %55 = arith.addf %52, %54 : vector<64x128xf32>
      %c0_33 = arith.constant 0 : index
      %c0_34 = arith.constant 0 : index
      %c0_35 = arith.constant 0 : index
      %56 = vector.load %arg9[%c0_33, %c0_34, %c0_35] : memref<1x64x128xf32, #tpu.memory_space<vmem>>, vector<1x64x128xf32>
      %57 = vector.shape_cast %56 : vector<1x64x128xf32> to vector<64x128xf32>
      %58 = vector.shape_cast %55 : vector<64x128xf32> to vector<1x64x128xf32>
      tpu.vector_store %arg9[%c0_33, %c0_34, %c0_35], %58 {strides = array<i32>} : memref<1x64x128xf32, #tpu.memory_space<vmem>>, vector<1x64x128xf32>,
    } else {
    }
    return
  }
  func.func @transform_0(%arg0: i32, %arg1: i32) -> (i32, i32, i32) {
    %c0_i32 = arith.constant 0 : i32
    %c0_i32_0 = arith.constant 0 : i32
    %c0_i32_1 = arith.constant 0 : i32
    return %arg0, %c0_i32, %c0_i32_0 : i32, i32, i32
  }
  func.func @transform_1(%arg0: i32, %arg1: i32) -> (i32, i32) {
    %c0_i32 = arith.constant 0 : i32
    %c0_i32_0 = arith.constant 0 : i32
    %c0_i32_1 = arith.constant 0 : i32
    return %c0_i32, %c0_i32_0 : i32, i32
  }
  func.func @transform_2(%arg0: i32, %arg1: i32) -> (i32, i32) {
    %c0_i32 = arith.constant 0 : i32
    %c0_i32_0 = arith.constant 0 : i32
    return %arg1, %c0_i32 : i32, i32
  }
  func.func @transform_3(%arg0: i32, %arg1: i32) -> (i32, i32) {
    %c0_i32 = arith.constant 0 : i32
    %c0_i32_0 = arith.constant 0 : i32
    return %arg1, %c0_i32 : i32, i32
  }
  func.func @transform_4(%arg0: i32, %arg1: i32) -> (i32, i32) {
    %c0_i32 = arith.constant 0 : i32
    %c0_i32_0 = arith.constant 0 : i32
    return %arg1, %c0_i32 : i32, i32
  }
  func.func @transform_5(%arg0: i32, %arg1: i32) -> (i32, i32) {
    %c0_i32 = arith.constant 0 : i32
    %c0_i32_0 = arith.constant 0 : i32
    return %c0_i32, %arg1 : i32, i32
  }
  func.func @transform_6(%arg0: i32, %arg1: i32) -> (i32, i32) {
    %c0_i32 = arith.constant 0 : i32
    %c0_i32_0 = arith.constant 0 : i32
    return %arg1, %c0_i32 : i32, i32
  }
  func.func @transform_7(%arg0: i32, %arg1: i32) -> (i32, i32, i32) {
    %c0_i32 = arith.constant 0 : i32
    %c0_i32_0 = arith.constant 0 : i32
    %c0_i32_1 = arith.constant 0 : i32
    return %arg0, %c0_i32, %c0_i32_0 : i32, i32, i32
  }
}

</mosaic_0001>

<bundles_post_ra>
// kernel: tpu_custom_call.1
= control target key start
LH: loop header
LB: loop body
LE: loop exit
PB: predicated region body
PF: predicated region fallthrough
CT: control target
= control target key end

     0   :  { %s4066_s0 = inlined_call_operand.vmem [shape: f32[3,1,128], index: 0, kind: input, shape index: {}]   ;;  %s4067_s1 = inlined_call_operand.vmem [shape: f32[1,128], index: 1, kind: input, shape index: {}]   ;;  %s4068_s2 = inlined_call_operand.vmem [shape: f32[1024,128], index: 2, kind: input, shape index: {}]   ;;  %s4069_s3 = inlined_call_operand.hbm [shape: f32[1024,128], index: 3, kind: input, shape index: {}]   ;;  %s4070_s4 = inlined_call_operand.hbm [shape: f32[1024,128], index: 4, kind: input, shape index: {}]   ;;  %s4071_s5 = inlined_call_operand.vmem [shape: s32[1,1024], index: 5, kind: input, shape index: {}]   ;;  %s4072_s6 = inlined_call_operand.vmem [shape: f32[1024,1], index: 6, kind: input, shape index: {}]   ;;  %s4073_s7 = inlined_call_operand.hbm [shape: f32[3,64,128], index: 7, kind: output, shape index: {}]  }
   0x1   :  { %4087 = sst [smem:[#allocation22_spill]] %s4069_s3 }
   0x2   :  { %4088 = sst [smem:[#allocation23_spill]] %s4070_s4 }
   0x3   :  { %12 = vsyncpa [#allocation5], 0 }
   0x4   :  { %14 = vsyncpa [#allocation5 + $0x1], 0 }
   0x5   :  { %15 = vsyncpa [#allocation8], 0 }
   0x6   :  { %17 = vsyncpa [#allocation8 + $0x1], 0 }
   0x7   :  { %18 = vsyncpa [#allocation6], 0 }
   0x8   :  { %20 = vsyncpa [#allocation6 + $0x1], 0  ;;  %s2810_s24 = smov 0   ;;  %s2812_s25 = smov 0  }
   0x9   :  { %s2814_s26 = smov 0   ;;  %s2816_s27 = smov 0  }
   0xa   :  { %s2818_s28 = smov 0   ;;  %s2820_s29 = smov 0  }
   0xb   :  { %s2822_s30 = smov 0   ;;  %s2824_s8 = smov 0  }
   0xc   :  { %s2826_s9 = smov 0   ;;  %s2828_s10 = smov 0  }
   0xd   :  { %s2830_s11 = smov 0  }
   0xe LB: > { %4089 = sst [smem:[#allocation13_spill]] %s2726_s26  ;;  %s2025_s12 = sadd.s32 4294967295, %s2758_s11   ;;  %s2758_s11 = sphi %s2830_s11, %s26_s11   ;;  %s2754_s10 = sphi %s2828_s10, %s4130_s10   ;;  %s2750_s9 = sphi %s2826_s9, %s4129_s9   ;;  %s2746_s8 = sphi %s2824_s8, %s4128_s8   ;;  %s2742_s30 = sphi %s2822_s30, %s4127_s30   ;;  %s2738_s29 = sphi %s2820_s29, %s4126_s29   ;;  %s2734_s28 = sphi %s2818_s28, %s4134_s28   ;;  %s2730_s27 = sphi %s2816_s27, %s4133_s27   ;;  %s2726_s26 = sphi %s2814_s26, %s4124_s26   ;;  %s2722_s25 = sphi %s2812_s25, %s4132_s25   ;;  %s2718_s24 = sphi %s2810_s24, %s4131_s24  }
   0xf   : > { %4090 = sst [smem:[#allocation14_spill]] %s2738_s29  ;;  %s2026_s13 = sadd.s32 4294967294, %s2758_s11  }
  0x10   : > { %4091 = sst [smem:[#allocation15_spill]] %s2750_s9  ;;  %s35_s14 = sadd.s32 1, %s2750_s9 }
  0x11   : > { %4092 = sst [smem:[#allocation16_spill]] %s2754_s10  ;;  %s38_s15 = sadd.s32 1, %s2754_s10 }
  0x12   : > { %p36_p0 = scmp.ge.s32.totalorder %s35_s14, 4  ;;  %s118_s16 = sadd.s32 1, %s2738_s29 }
  0x13   : > { %p125_p1 = scmp.ne.s32.totalorder %s2738_s29, %s2734_s28  ;;  %p126_p2 = scmp.eq.s32.totalorder %s2758_s11, 0 }
  0x14   : > { %s4136_s14 = smov (%p36_p0, %s35_s14), 0  ;;  %s4138_s15 = smov (!%p36_p0, %s38_s15), %s2754_s10 }
  0x15   : > { %4093 = sst [smem:[#allocation17_spill]] %s4136_s14  ;;  %s115_s17 = ssub.s32 %s2750_s9, %s4136_s14 }
  0x16   : > { %p2876_p3 = por %p126_p2, %p125_p1  ;;  %p40_p4 = scmp.ge.s32.totalorder %s4138_s15, 3 }
  0x17   : > { %p116_p5 = scmp.eq.s32.totalorder %s115_s17, 0  ;;  %p131_p6 = scmp.ne.s32.totalorder %s2734_s28, %s2730_s27 }
  0x18   : > { %p132_p7 = scmp.eq.s32.totalorder %s2025_s12, 0  ;;  %s4140_s15 = smov (%p40_p4, %s4138_s15), 0 }
  0x19   : > { %4095 = sst [smem:[#allocation18_spill]] %s4140_s15  ;;  %s219_s21 = ssub.s32 %s2754_s10, %s4140_s15 }
  0x1a   : > { %s2884_s19 = scalar_select %p116_p5, %s2738_s29, %s118_s16  }
  0x1b   : > { %p2886_p8 = por %p132_p7, %p131_p6  ;;  %p220_p9 = scmp.eq.s32.totalorder %s219_s21, 0 }
  0x1c   : > { %4096 = sst [smem:[#allocation19_spill]] %s2884_s19  ;;  %s222_s22 = sadd.s32 1, %s2726_s26 }
  0x1d   : > { %s4097_s20 = scalar_select %p2886_p8, 1, 0 }
  0x1e   : > { %p232_p10 = scmp.ne.s32.totalorder %s2726_s26, %s2722_s25  ;;  %p233_p11 = scmp.eq.s32.totalorder %s2025_s12, 11 }
  0x1f   : > { %s2896_s23 = scalar_select %p220_p9, %s2726_s26, %s222_s22  }
  0x20   : > { %p2898_p12 = por %p233_p11, %p232_p10  ;;  %p238_p13 = scmp.ne.s32.totalorder %s2722_s25, %s2718_s24 }
  0x21   : > { %4098 = sst [smem:[#allocation20_spill]] %s2896_s23  ;;  %p239_p0 = scmp.eq.s32.totalorder %s2026_s13, 11 }
  0x22   : > { %s4099_s27 = scalar_select %p2898_p12, 1, 0 }
  0x23   : > { %p2297_p1 = scmp.lt.s32.totalorder %s2758_s11, 12  ;;  %s2906_s16 = sand.u32 1, %s2738_s29  }
  0x24   : > { %p2908_p2 = por %p239_p0, %p238_p13  ;;  %s4078_s21 = sshll.u32 %s2906_s16, 8 }
  0x25   : > { %s4079_s12 = sshll.u32 %s2750_s9, 12  ;;  %s4102_s3 = sld [smem:[#allocation22_spill]] }
  0x26   : > { %s4100_s17 = scalar_select %p2908_p2, 1, 0 }
  0x27   : > { %s281_s13 = scalar_lea.vmem [#allocation4], %s4078_s21  ;;  %p2925_p4 = pnand %p2297_p1, %p2876_p3 }
  0x28   : > { %4101 = sst [smem:[#allocation21_spill]] %s4100_s17  ;;  %s288_s10 = sshll.u32 %s281_s13, 4  ;;  %s2929_s10 = int_to_ptr.vmem [resolvable:$true] %s288_s10 }
  0x29   : > { %p2574_p6 = pneg %p2925_p4 }
  0x2b   : > { %s2919_s14 = scalar_lea.hbm %s4102_s3, %s4079_s12  ;;  %s2577_s18 = scalar_lea.hbm %s4102_s3, 16384 }
  0x2c   : > { %s2572_s15 = scalar_lea.hbm %s2919_s14, 4096  ;;  %p2578_p3 = scmp.lt.u32.totalorder %s2919_s14, %s4102_s3 }
  0x2d   : > { %p2573_p5 = scmp.ne.s32.totalorder %s2919_s14, %s2572_s15  ;;  %p2579_p10 = scmp.lt.u32.totalorder %s2577_s18, %s2572_s15 }
  0x2e   : > { %p2581_p13 = scmp.lt.u32.totalorder %s2572_s15, %s2919_s14 }
  0x2f   : > { %p2575_p7 = pnand %p2574_p6, %p2573_p5  ;;  %p2580_p11 = por %p2579_p10, %p2578_p3 }
  0x31   : > { %p2576_p9 = pneg %p2575_p7  ;;  %p2582_p0 = por %p2581_p13, %p2580_p11 }
  0x33   : > { %p2583_p1 = pnand %p2582_p0, %p2576_p9 }
  0x35   : > { %2586 = shalt.err (!%p2583_p1)
}
  0x36   : > { %s2587_s29 = scalar_lea.vmem %s2929_s10, 4096  ;;  %s2760_s22 = smov [#allocation4]  }
  0x37   : > { %p2588_p5 = scmp.ne.s32.totalorder %s2929_s10, %s2587_s29  ;;  %s2592_s13 = sshll.u32 %s2760_s22, 4  ;;  %s2593_s13 = int_to_ptr.vmem [resolvable:$false] %s2592_s13 }
  0x38   : > { %s2594_s21 = scalar_lea.vmem %s2593_s13, 8192  ;;  %p2595_p12 = scmp.lt.s32.totalorder %s2929_s10, %s2593_s13 }
  0x39   : > { %p2590_p7 = pnand %p2588_p5, %p2574_p6  ;;  %p2596_p3 = scmp.lt.s32.totalorder %s2594_s21, %s2587_s29 }
  0x3b   : > { %p2591_p2 = pneg %p2590_p7  ;;  %p2597_p10 = por %p2596_p3, %p2595_p12 }
  0x3d   : > { %p2598_p11 = pnand %p2597_p10, %p2591_p2 }
  0x3f   : > { %2601 = shalt.err (!%p2598_p11)
}
  0x40   : > { %s4083_s12 = smov 128   ;;  %s2762_s15 = smov 8  }
  0x41   : > { %s4104_s29 = scalar_lea.sflag [#allocation5], %s2906_s16  ;;  %p2035_p12 = scmp.ge.s32.totalorder %s2758_s11, 1 }
  0x42   : > { %2289 = dma.hbm_to_vmem [thread:$0]  (!%p2925_p4), %s2919_s14, 4096, %s2929_s10, %s4104_s29, %s4083_s12, %s4083_s12, %s2762_s15  }
  0x43   : > { %p334_p2 = scmp.lt.s32.totalorder %s2758_s11, 13  ;;  %s4106_s22 = sshll.u32 %s2750_s9, 12 }
  0x44   : > { %s4107_s4 = sld [smem:[#allocation23_spill]]  ;;  %s4108_s23 = sshll.u32 %s2906_s16, 8 }
  0x45   : > { %p2964_p9 = pnand %p2035_p12, %p334_p2  ;;  %s302_s26 = scalar_lea.vmem [#allocation7], %s4108_s23 }
  0x46   : > { %s309_s17 = sshll.u32 %s302_s26, 4  ;;  %s299_s10 = scalar_lea.sflag [#allocation8], %s2906_s16  ;;  %s2977_s17 = int_to_ptr.vmem [resolvable:$true] %s309_s17 }
  0x4a   : > { %s2973_s3 = scalar_lea.hbm %s4107_s4, %s4106_s22  ;;  %s2607_s22 = scalar_lea.hbm %s4107_s4, 16384 }
  0x4b   : > { %s2602_s14 = scalar_lea.hbm %s2973_s3, 4096  ;;  %p2608_p5 = scmp.lt.u32.totalorder %s2973_s3, %s4107_s4 }
  0x4c   : > { %p2603_p13 = scmp.ne.s32.totalorder %s2973_s3, %s2602_s14  ;;  %p2609_p7 = scmp.lt.u32.totalorder %s2607_s22, %s2602_s14 }
  0x4d   : > { %p2611_p10 = scmp.lt.u32.totalorder %s2602_s14, %s2973_s3 }
  0x4e   : > { %p2605_p0 = pnand %p2603_p13, %p2574_p6  ;;  %p2610_p3 = por %p2609_p7, %p2608_p5 }
  0x50   : > { %p2606_p1 = pneg %p2605_p0  ;;  %p2612_p11 = por %p2611_p10, %p2610_p3 }
  0x52   : > { %p2613_p12 = pnand %p2612_p11, %p2606_p1 }
  0x54   : > { %2616 = shalt.err (!%p2613_p12)
}
  0x55   : > { %s2617_s26 = scalar_lea.vmem %s2977_s17, 4096  ;;  %s2763_s23 = smov [#allocation7]  }
  0x56   : > { %p2618_p2 = scmp.ne.s32.totalorder %s2977_s17, %s2617_s26  ;;  %s2622_s29 = sshll.u32 %s2763_s23, 4  ;;  %s2623_s29 = int_to_ptr.vmem [resolvable:$false] %s2622_s29 }
  0x57   : > { %s2624_s12 = scalar_lea.vmem %s2623_s29, 8192  ;;  %p2625_p8 = scmp.lt.s32.totalorder %s2977_s17, %s2623_s29 }
  0x58   : > { %p2620_p13 = pnand %p2618_p2, %p2574_p6  ;;  %p2626_p5 = scmp.lt.s32.totalorder %s2624_s12, %s2617_s26 }
  0x5a   : > { %p2621_p0 = pneg %p2620_p13  ;;  %p2627_p7 = por %p2626_p5, %p2625_p8 }
  0x5c   : > { %p2628_p3 = pnand %p2627_p7, %p2621_p0 }
  0x5e   : > { %2631 = shalt.err (!%p2628_p3)
}
  0x5f   : > { %s4109_s14 = smov 128   ;;  %338 = sbr.rel (%p2964_p9) target bundleno = 844 (0x34c), region = 48 }
  0x60   : > { %2292 = dma.hbm_to_vmem [thread:$0]  (!%p2925_p4), %s2973_s3, 4096, %s2977_s17, %s299_s10, %s4109_s14, %s4109_s14, %s2762_s15  }
  0x61   : > { %s340_s13 = sand.u32 (!%p2964_p9), 1, %s2734_s28   ;;  %p4110_p8 = scmp.ne.s32.totalorder (!%p2964_p9), %s4097_s20, 0 }
  0x62   : > { %s2036_s22 = sshll.u32 (!%p2964_p9), %s340_s13, 8  ;;  %s341_s21 = scalar_lea.sflag (!%p2964_p9), [#allocation5], %s340_s13 }
  0x63   : > { %s3011_s26 = scalar_lea.vmem (!%p2964_p9), [#allocation4], %s2036_s22 }
  0x66   : > { %2705 = dma.done.wait (%p4110_p8), %s341_s21, 4096  }
  0x67   : > { %2707 = vsyncadd (%p4110_p8), %s341_s21, 4294963200  ;;  %s350_s19 = scalar_lea.sflag [#allocation8], %s340_s13  ;;  %s3017_s16 = scalar_lea.vmem [#allocation7], %s2036_s22 }
  0x68   : > { %2709 = dma.done.wait (%p4110_p8), %s350_s19, 4096  }
  0x69   : > { %2711 = vsyncadd (%p4110_p8), %s350_s19, 4294963200  ;;  %s4085_s3 = sand.u32 1, %s2722_s25   ;;  %p406_p4 = scmp.lt.s32.totalorder %s2746_s8, 2 }
  0x6a   : > { %s2038_s17 = sshll.u32 %s4085_s3, 6  ;;  %s2039_s15 = sshll.u32 %s2742_s30, 5 }
  0x6b   : > { %p410_p6 = scmp.lt.s32.totalorder %s2039_s15, 127  ;;  %s2041_s29 = sshll.u32 %s2742_s30, 1 }
  0x6c   : > { %s3029_s18 = scalar_select %p406_p4, %s2746_s8, 2 }
  0x6d   : > { %s4142_s15 = smov (!%p410_p6, %s2039_s15), 127  ;;  %p418_p9 = scmp.lt.s32.totalorder %s2041_s29, 7 }
  0x6e   : > { %s408_s20 = scalar_lea.vmem %s4066_s0, %s3029_s18  ;;  %s2040_s12 = sshll.u32 %s4142_s15, 3 }
  0x6f   : > { %s3039_s22 = scalar_lea.vmem %s4068_s2, %s2040_s12  ;;  %s3044_s3 = scalar_lea.vmem %s4072_s6, %s2040_s12 }
  0x70   : > { %s4144_s29 = smov (!%p418_p9, %s2041_s29), 7  ;;  %s3052_s10 = scalar_lea.vmem [#allocation9], %s2038_s17 }
  0x71   : > { %s420_s18 = scalar_lea.vmem %s4071_s5, %s4144_s29  ;;  %p2044_p1 = scmp.ne.s32.totalorder %s2742_s30, 0 }
  0x72   : > { %v2764_v0 = vmov (!%p2044_p1), 0.0  }
  0x73   : > { %431 = sbr.rel (%p2044_p1) target bundleno = 123 (0x7b), region = 60  ;;  %432 = vst [vmem:[#allocation2] sm:$0xff] (!%p2044_p1), %v2764_v0  ;;  %433 = vst [vmem:[#allocation2 + $0x8] sm:$0xff] (!%p2044_p1), %v2764_v0 }
  0x74   : > { %434 = vst [vmem:[#allocation2 + $0x10] sm:$0xff] (!%p2044_p1), %v2764_v0  ;;  %435 = vst [vmem:[#allocation2 + $0x18] sm:$0xff] (!%p2044_p1), %v2764_v0 }
  0x75   : > { %436 = vst [vmem:[#allocation2 + $0x20] sm:$0xff] (!%p2044_p1), %v2764_v0  ;;  %437 = vst [vmem:[#allocation2 + $0x28] sm:$0xff] (!%p2044_p1), %v2764_v0 }
  0x76   : > { %438 = vst [vmem:[#allocation2 + $0x30] sm:$0xff] (!%p2044_p1), %v2764_v0  ;;  %439 = vst [vmem:[#allocation2 + $0x38] sm:$0xff] (!%p2044_p1), %v2764_v0 }
  0x77   : > { %440 = vst [vmem:[#allocation3] sm:$0xff] (!%p2044_p1), %v2764_v0  ;;  %441 = vst [vmem:[#allocation3 + $0x8] sm:$0xff] (!%p2044_p1), %v2764_v0 }
  0x78   : > { %442 = vst [vmem:[#allocation3 + $0x10] sm:$0xff] (!%p2044_p1), %v2764_v0  ;;  %443 = vst [vmem:[#allocation3 + $0x18] sm:$0xff] (!%p2044_p1), %v2764_v0 }
  0x79   : > { %444 = vst [vmem:[#allocation3 + $0x20] sm:$0xff] (!%p2044_p1), %v2764_v0  ;;  %445 = vst [vmem:[#allocation3 + $0x28] sm:$0xff] (!%p2044_p1), %v2764_v0 }
  0x7a   : > { %446 = vst [vmem:[#allocation3 + $0x30] sm:$0xff] %v2764_v0  ;;  %447 = vst [vmem:[#allocation3 + $0x38] sm:$0xff] %v2764_v0 }
  0x7b PF: > { %v3055_v1 = vld [vmem:[%s408_s20] ss:$0 sm:$0xff]  ;;  %v466_v12 = vld [vmem:[%s3039_s22 + $0x88] sm:$0xff]  ;;  %v467_v24 = vld [vmem:[%s3039_s22 + $0x90] sm:$0xff]  ;;  %p2094_p10 = scmp.ne.s32.totalorder %s2742_s30, 3 }
  0x7c   : > { %v465_v2 = vld [vmem:[%s3039_s22 + $0x80] sm:$0xff]  ;;  %v536_v13 = vld [vmem:[%s3011_s26 + $0x88] sm:$0xff]  ;;  %v504_v15 = vmul.f32 %v3055_v1, %v466_v12  ;;  %v537_v25 = vld [vmem:[%s3011_s26 + $0x90] sm:$0xff]  ;;  %v505_v28 = vmul.f32 %v3055_v1, %v467_v24 }
  0x7d   : > { %v535_v3 = vld [vmem:[%s3011_s26 + $0x80] sm:$0xff]  ;;  %v503_v4 = vmul.f32 %v3055_v1, %v465_v2  ;;  %v3075_v16 = vmul.f32 %v3055_v1, %v536_v13  ;;  %v600_v17 = vld [vmem:[%s3017_s16 + $0x88] sm:$0xff]  ;;  %v3090_v29 = vmul.f32 %v3055_v1, %v537_v25  ;;  %v601_v30 = vld [vmem:[%s3017_s16 + $0x90] sm:$0xff] }
  0x7e   : > { %v3061_v5 = vmul.f32 %v3055_v1, %v535_v3  ;;  %v599_v6 = vld [vmem:[%s3017_s16 + $0x80] sm:$0xff]  ;;  %v450_v18 = vld [vmem:[%s3039_s22 + $0x8] sm:$0xff]  ;;  %v632_v27 = vadd.f32 %v600_v17, %v504_v15  ;;  %v468_v31 = vld [vmem:[%s3039_s22 + $0x98] sm:$0xff]  ;;  %v633_v42 = vadd.f32 %v601_v30, %v505_v28 }
  0x7f   : > { %v449_v7 = vld [vmem:[%s3039_s22] sm:$0xff]  ;;  %v631_v14 = vadd.f32 %v599_v6, %v503_v4  ;;  %v520_v19 = vld [vmem:[%s3011_s26 + $0x8] sm:$0xff]  ;;  %v488_v21 = vmul.f32 %v3055_v1, %v450_v18  ;;  %v538_v32 = vld [vmem:[%s3011_s26 + $0x98] sm:$0xff]  ;;  %v506_v35 = vmul.f32 %v3055_v1, %v468_v31 }
  0x80   : > { %v519_v8 = vld [vmem:[%s3011_s26] sm:$0xff]  ;;  %v487_v9 = vmul.f32 %v3055_v1, %v449_v7  ;;  %v3082_v22 = vmul.f32 %v3055_v1, %v520_v19  ;;  %v584_v23 = vld [vmem:[%s3017_s16 + $0x8] sm:$0xff]  ;;  %v3098_v36 = vmul.f32 %v3055_v1, %v538_v32  ;;  %v602_v37 = vld [vmem:[%s3017_s16 + $0x98] sm:$0xff]  ;;  %v664_v41 = vsub.f32 %v632_v27, %v3075_v16 }
  0x81   : > { %v3068_v10 = vmul.f32 %v3055_v1, %v519_v8  ;;  %v583_v11 = vld [vmem:[%s3017_s16] sm:$0xff]  ;;  %v663_v26 = vsub.f32 %v631_v14, %v3061_v5  ;;  %v616_v34 = vadd.f32 %v584_v23, %v488_v21  ;;  %v451_v38 = vld [vmem:[%s3039_s22 + $0x10] sm:$0xff]  ;;  %v452_v45 = vld [vmem:[%s3039_s22 + $0x18] sm:$0xff]  ;;  %v634_v49 = vadd.f32 %v602_v37, %v506_v35 }
  0x82   : > { %v615_v20 = vadd.f32 %v583_v11, %v487_v9  ;;  %v521_v39 = vld [vmem:[%s3011_s26 + $0x10] sm:$0xff]  ;;  %v489_v43 = vmul.f32 %v3055_v1, %v451_v38  ;;  %v522_v46 = vld [vmem:[%s3011_s26 + $0x18] sm:$0xff]  ;;  %v470_v52 = vld [vmem:[%s3039_s22 + $0xa8] sm:$0xff]  ;;  %v696_v53 = vmul.f32 %v664_v41, %v664_v41  ;;  %v665_v54 = vsub.f32 %v633_v42, %v3090_v29 }
  0x83   : > { %v695_v40 = vmul.f32 %v663_v26, %v663_v26  ;;  %v585_v44 = vld [vmem:[%s3017_s16 + $0x10] sm:$0xff]  ;;  %v648_v48 = vsub.f32 %v616_v34, %v3082_v22  ;;  %v3110_v50 = vmul.f32 %v3055_v1, %v521_v39  ;;  %v586_v51 = vld [vmem:[%s3017_s16 + $0x18] sm:$0xff]  ;;  %v490_v56 = vmul.f32 %v3055_v1, %v452_v45  ;;  %v469_v57 = vld [vmem:[%s3039_s22 + $0xa0] sm:$0xff] }
  0x84   : > { %v647_v33 = vsub.f32 %v615_v20, %v3068_v10  ;;  %v617_v55 = vadd.f32 %v585_v44, %v489_v43  ;;  %v666_v59 = vsub.f32 %v634_v49, %v3098_v36  ;;  %v3119_v60 = vmul.f32 %v3055_v1, %v522_v46  ;;  %v540_v62 = vld [vmem:[%s3011_s26 + $0xa8] sm:$0xff]  ;;  %v539_v0 = vld [vmem:[%s3011_s26 + $0xa0] sm:$0xff]  ;;  %v471_v15 = vld [vmem:[%s3039_s22 + $0xb0] sm:$0xff] }
  0x85   : > { %743 = vadd.xlane.f32.xlu0 %v695_v40  ;;  %v680_v58 = vmul.f32 %v648_v48, %v648_v48  ;;  %v508_v61 = vmul.f32 %v3055_v1, %v470_v52  ;;  %v604_v63 = vld [vmem:[%s3017_s16 + $0xa8] sm:$0xff]  ;;  %v618_v2 = vadd.f32 %v586_v51, %v490_v56  ;;  %v603_v3 = vld [vmem:[%s3017_s16 + $0xa0] sm:$0xff]  ;;  %v697_v7 = vmul.f32 %v665_v54, %v665_v54  ;;  %v472_v26 = vld [vmem:[%s3039_s22 + $0xb8] sm:$0xff] }
  0x86   : > { %v679_v47 = vmul.f32 %v647_v33, %v647_v33  ;;  %v454_v4 = vld [vmem:[%s3039_s22 + $0x28] sm:$0xff]  ;;  %v453_v6 = vld [vmem:[%s3039_s22 + $0x20] sm:$0xff]  ;;  %v649_v8 = vsub.f32 %v617_v55, %v3110_v50  ;;  %v507_v9 = vmul.f32 %v3055_v1, %v469_v57  ;;  %v698_v11 = vmul.f32 %v666_v59, %v666_v59  ;;  %v541_v34 = vld [vmem:[%s3011_s26 + $0xb0] sm:$0xff] }
  0x87   : > { %v3131_v12 = vmul.f32 %v3055_v1, %v540_v62  ;;  %v636_v13 = vadd.f32 %v604_v63, %v508_v61  ;;  %v3134_v14 = vmul.f32 %v3055_v1, %v539_v0  ;;  %v650_v17 = vsub.f32 %v618_v2, %v3119_v60  ;;  %v524_v20 = vld [vmem:[%s3011_s26 + $0x28] sm:$0xff]  ;;  %v523_v23 = vld [vmem:[%s3011_s26 + $0x20] sm:$0xff]  ;;  %v605_v35 = vld [vmem:[%s3017_s16 + $0xb0] sm:$0xff] }
  0x88   : > { %711 = vadd.xlane.f32.xlu1 %v679_v47  ;;  %v635_v18 = vadd.f32 %v603_v3, %v507_v9  ;;  %v492_v19 = vmul.f32 %v3055_v1, %v454_v4  ;;  %v491_v21 = vmul.f32 %v3055_v1, %v453_v6  ;;  %v587_v24 = vld [vmem:[%s3017_s16 + $0x20] sm:$0xff]  ;;  %v588_v25 = vld [vmem:[%s3017_s16 + $0x28] sm:$0xff]  ;;  %v681_v27 = vmul.f32 %v649_v8, %v649_v8  ;;  %v456_v37 = vld [vmem:[%s3039_s22 + $0x38] sm:$0xff] }
  0x89   : > { %745 = vadd.xlane.f32.xlu0 %v696_v53  ;;  %v509_v28 = vmul.f32 %v3055_v1, %v471_v15  ;;  %v3148_v31 = vmul.f32 %v3055_v1, %v524_v20  ;;  %v3151_v32 = vmul.f32 %v3055_v1, %v523_v23  ;;  %v682_v38 = vmul.f32 %v650_v17, %v650_v17  ;;  %v455_v42 = vld [vmem:[%s3039_s22 + $0x30] sm:$0xff]  ;;  %v542_v43 = vld [vmem:[%s3011_s26 + $0xb8] sm:$0xff]  ;;  %v473_v61 = vld [vmem:[%s3039_s22 + $0xc0] sm:$0xff] }
  0x8a   : > { %v667_v30 = vsub.f32 %v635_v18, %v3134_v14  ;;  %v619_v33 = vadd.f32 %v587_v24, %v491_v21  ;;  %v668_v39 = vsub.f32 %v636_v13, %v3131_v12  ;;  %v620_v40 = vadd.f32 %v588_v25, %v492_v19  ;;  %v606_v44 = vld [vmem:[%s3017_s16 + $0xb8] sm:$0xff]  ;;  %v589_v59 = vld [vmem:[%s3017_s16 + $0x30] sm:$0xff]  ;;  %v474_v62 = vld [vmem:[%s3039_s22 + $0xc8] sm:$0xff] }
  0x8b   : > { %v510_v41 = vmul.f32 %v3055_v1, %v472_v26  ;;  %v3162_v45 = vmul.f32 %v3055_v1, %v541_v34  ;;  %v637_v46 = vadd.f32 %v605_v35, %v509_v28  ;;  %v494_v47 = vmul.f32 %v3055_v1, %v456_v37  ;;  %v526_v51 = vld [vmem:[%s3011_s26 + $0x38] sm:$0xff]  ;;  %v543_v13 = vld [vmem:[%s3011_s26 + $0xc0] sm:$0xff]  ;;  %v544_v18 = vld [vmem:[%s3011_s26 + $0xc8] sm:$0xff] }
  0x8c   : > { %713 = vadd.xlane.f32.xlu1 %v680_v58  ;;  %v699_v48 = vmul.f32 %v667_v30, %v667_v30  ;;  %v651_v49 = vsub.f32 %v619_v33, %v3151_v32  ;;  %v590_v52 = vld [vmem:[%s3017_s16 + $0x38] sm:$0xff]  ;;  %v493_v53 = vmul.f32 %v3055_v1, %v455_v42  ;;  %v700_v54 = vmul.f32 %v668_v39, %v668_v39  ;;  %v525_v58 = vld [vmem:[%s3011_s26 + $0x30] sm:$0xff]  ;;  %v607_v15 = vld [vmem:[%s3017_s16 + $0xc0] sm:$0xff] }
  0x8d   : > { %747 = vadd.xlane.f32.xlu0 %v697_v7  ;;  %v652_v55 = vsub.f32 %v620_v40, %v3148_v31  ;;  %v3171_v56 = vmul.f32 %v3055_v1, %v542_v43  ;;  %v638_v57 = vadd.f32 %v606_v44, %v510_v41  ;;  %v669_v63 = vsub.f32 %v637_v46, %v3162_v45  ;;  %v457_v17 = vld [vmem:[%s3039_s22 + $0x40] sm:$0xff]  ;;  %v608_v19 = vld [vmem:[%s3017_s16 + $0xc8] sm:$0xff]  ;;  %v475_v28 = vld [vmem:[%s3039_s22 + $0xd0] sm:$0xff] }
  0x8e   : > { %v3179_v0 = vmul.f32 %v3055_v1, %v526_v51  ;;  %v622_v2 = vadd.f32 %v590_v52, %v494_v47  ;;  %v683_v3 = vmul.f32 %v651_v49, %v651_v49  ;;  %v3182_v4 = vmul.f32 %v3055_v1, %v525_v58  ;;  %v458_v20 = vld [vmem:[%s3039_s22 + $0x48] sm:$0xff]  ;;  %v527_v37 = vld [vmem:[%s3011_s26 + $0x40] sm:$0xff]  ;;  %v476_v41 = vld [vmem:[%s3039_s22 + $0xd8] sm:$0xff] }
  0x8f   : > { %v621_v6 = vadd.f32 %v589_v59, %v493_v53  ;;  %v511_v7 = vmul.f32 %v3055_v1, %v473_v61  ;;  %v684_v8 = vmul.f32 %v652_v55, %v652_v55  ;;  %v670_v9 = vsub.f32 %v638_v57, %v3171_v56  ;;  %v528_v39 = vld [vmem:[%s3011_s26 + $0x48] sm:$0xff]  ;;  %v545_v49 = vld [vmem:[%s3011_s26 + $0xd0] sm:$0xff]  ;;  %v460_v52 = vld [vmem:[%s3039_s22 + $0x58] sm:$0xff] }
  0x90   : > { %749 = vadd.xlane.f32.xlu1 %v698_v11  ;;  %v512_v11 = vmul.f32 %v3055_v1, %v474_v62  ;;  %v701_v21 = vmul.f32 %v669_v63, %v669_v63  ;;  %v654_v23 = vsub.f32 %v622_v2, %v3179_v0  ;;  %v3196_v25 = vmul.f32 %v3055_v1, %v543_v13  ;;  %v592_v40 = vld [vmem:[%s3017_s16 + $0x48] sm:$0xff]  ;;  %v609_v51 = vld [vmem:[%s3017_s16 + $0xd0] sm:$0xff]  ;;  %v546_v59 = vld [vmem:[%s3011_s26 + $0xd8] sm:$0xff] }
  0x91   : > { %715 = vadd.xlane.f32.xlu0 %v681_v27  ;;  %v653_v24 = vsub.f32 %v621_v6, %v3182_v4  ;;  %v639_v26 = vadd.f32 %v607_v15, %v511_v7  ;;  %v495_v27 = vmul.f32 %v3055_v1, %v457_v17  ;;  %v702_v30 = vmul.f32 %v670_v9, %v670_v9  ;;  %v459_v58 = vld [vmem:[%s3039_s22 + $0x50] sm:$0xff]  ;;  %v610_v61 = vld [vmem:[%s3017_s16 + $0xd8] sm:$0xff] }
  0x92   : > { %v3201_v33 = vmul.f32 %v3055_v1, %v544_v18  ;;  %v640_v34 = vadd.f32 %v608_v19, %v512_v11  ;;  %v496_v35 = vmul.f32 %v3055_v1, %v458_v20  ;;  %v686_v42 = vmul.f32 %v654_v23, %v654_v23  ;;  %v530_v7 = vld [vmem:[%s3011_s26 + $0x58] sm:$0xff]  ;;  %v529_v18 = vld [vmem:[%s3011_s26 + $0x50] sm:$0xff]  ;;  %v477_v20 = vld [vmem:[%s3039_s22 + $0xe0] sm:$0xff] }
  0x93   : > { %v513_v43 = vmul.f32 %v3055_v1, %v475_v28  ;;  %v685_v44 = vmul.f32 %v653_v24, %v653_v24  ;;  %v671_v46 = vsub.f32 %v639_v26, %v3196_v25  ;;  %v3212_v47 = vmul.f32 %v3055_v1, %v527_v37  ;;  %v593_v19 = vld [vmem:[%s3017_s16 + $0x50] sm:$0xff] }
  0x94   : > { %717 = vadd.xlane.f32.xlu1 %v682_v38  ;;  %v591_v38 = vld [vmem:[%s3017_s16 + $0x40] sm:$0xff]  ;;  %v672_v53 = vsub.f32 %v640_v34, %v3201_v33  ;;  %v624_v55 = vadd.f32 %v592_v40, %v496_v35  ;;  %v514_v57 = vmul.f32 %v3055_v1, %v476_v41  ;;  %v3226_v62 = vmul.f32 %v3055_v1, %v545_v49 }
  0x95   : > { %751 = vadd.xlane.f32.xlu0 %v699_v48  ;;  %v623_v48 = vadd.f32 %v591_v38, %v495_v27  ;;  %v641_v63 = vadd.f32 %v609_v51, %v513_v43  ;;  %v498_v2 = vmul.f32 %v3055_v1, %v460_v52  ;;  %v497_v9 = vmul.f32 %v3055_v1, %v459_v58  ;;  %v611_v40 = vld [vmem:[%s3017_s16 + $0xe0] sm:$0xff]  ;;  %v612_v43 = vld [vmem:[%s3017_s16 + $0xe8] sm:$0xff] }
  0x96   : > { %v704_v11 = vmul.f32 %v672_v53, %v672_v53  ;;  %v3235_v15 = vmul.f32 %v3055_v1, %v546_v59  ;;  %v642_v17 = vadd.f32 %v610_v61, %v514_v57  ;;  %v3243_v24 = vmul.f32 %v3055_v1, %v530_v7  ;;  %v461_v41 = vld [vmem:[%s3039_s22 + $0x60] sm:$0xff]  ;;  %v480_v7 = vld [vmem:[%s3039_s22 + $0xf8] sm:$0xff] }
  0x97   : > { %v655_v6 = vsub.f32 %v623_v48, %v3212_v47  ;;  %v673_v23 = vsub.f32 %v641_v63, %v3226_v62  ;;  %v3246_v28 = vmul.f32 %v3055_v1, %v529_v18  ;;  %v515_v34 = vmul.f32 %v3055_v1, %v477_v20  ;;  %v595_v63 = vld [vmem:[%s3017_s16 + $0x60] sm:$0xff]  ;;  %v550_v18 = vld [vmem:[%s3011_s26 + $0xf8] sm:$0xff]  ;;  %v549_v20 = vld [vmem:[%s3011_s26 + $0xf0] sm:$0xff] }
  0x98   : > { %753 = vadd.xlane.f32.xlu1 %v700_v54  ;;  %v3219_v54 = vmul.f32 %v3055_v1, %v528_v39  ;;  %v674_v37 = vsub.f32 %v642_v17, %v3235_v15  ;;  %v547_v39 = vld [vmem:[%s3011_s26 + $0xe0] sm:$0xff]  ;;  %v499_v53 = vmul.f32 %v3055_v1, %v461_v41 }
  0x99   : > { %719 = vadd.xlane.f32.xlu0 %v683_v3  ;;  %v703_v3 = vmul.f32 %v671_v46, %v671_v46  ;;  %v687_v27 = vmul.f32 %v655_v6, %v655_v6  ;;  %v705_v46 = vmul.f32 %v673_v23, %v673_v23  ;;  %v3260_v51 = vmul.f32 %v3055_v1, %v547_v39  ;;  %v596_v6 = vld [vmem:[%s3017_s16 + $0x68] sm:$0xff] }
  0x9a   : > { %v656_v13 = vsub.f32 %v624_v55, %v3219_v54  ;;  %v643_v52 = vadd.f32 %v611_v40, %v515_v34  ;;  %v531_v55 = vld [vmem:[%s3011_s26 + $0x60] sm:$0xff]  ;;  %v706_v57 = vmul.f32 %v674_v37, %v674_v37  ;;  %v627_v17 = vadd.f32 %v595_v63, %v499_v53  ;;  %v463_v34 = vld [vmem:[%s3039_s22 + $0x70] sm:$0xff]  ;;  %v464_v37 = vld [vmem:[%s3039_s22 + $0x78] sm:$0xff] }
  0x9b   : > { %v3293_v39 = vmul.f32 %v3055_v1, %v549_v20  ;;  %v597_v53 = vld [vmem:[%s3017_s16 + $0x70] sm:$0xff] }
  0x9c   : > { %721 = vadd.xlane.f32.xlu1 %v684_v8  ;;  %v594_v8 = vld [vmem:[%s3017_s16 + $0x58] sm:$0xff]  ;;  %v688_v35 = vmul.f32 %v656_v13, %v656_v13  ;;  %v675_v13 = vsub.f32 %v643_v52, %v3260_v51  ;;  %v533_v52 = vld [vmem:[%s3011_s26 + $0x70] sm:$0xff] }
  0x9d   : > { %755 = vadd.xlane.f32.xlu0 %v701_v21  ;;  %v478_v21 = vld [vmem:[%s3039_s22 + $0xe8] sm:$0xff]  ;;  %v626_v26 = vadd.f32 %v594_v8, %v498_v2  ;;  %v479_v2 = vld [vmem:[%s3039_s22 + $0xf0] sm:$0xff]  ;;  %v3305_v63 = vmul.f32 %v3055_v1, %v533_v52 }
  0x9e   : > { %v516_v38 = vmul.f32 %v3055_v1, %v478_v21  ;;  %v707_v40 = vmul.f32 %v675_v13, %v675_v13 }
  0x9f   : > { %v658_v48 = vsub.f32 %v626_v26, %v3243_v24 }
  0xa0   : > { %757 = vadd.xlane.f32.xlu1 %v702_v30  ;;  %v625_v30 = vadd.f32 %v593_v19, %v497_v9  ;;  %v644_v59 = vadd.f32 %v612_v43, %v516_v38  ;;  %v3274_v9 = vmul.f32 %v3055_v1, %v531_v55  ;;  %v517_v19 = vmul.f32 %v3055_v1, %v479_v2  ;;  %v534_v55 = vld [vmem:[%s3011_s26 + $0x78] sm:$0xff] }
  0xa1   : > { %723 = vadd.xlane.f32.xlu0 %v685_v44  ;;  %v462_v44 = vld [vmem:[%s3039_s22 + $0x68] sm:$0xff]  ;;  %v690_v8 = vmul.f32 %v658_v48, %v658_v48  ;;  %v3290_v38 = vmul.f32 %v3055_v1, %v550_v18  ;;  %v501_v43 = vmul.f32 %v3055_v1, %v463_v34 }
  0xa2   : > { %v657_v49 = vsub.f32 %v625_v30, %v3246_v28  ;;  %v500_v61 = vmul.f32 %v3055_v1, %v462_v44  ;;  %v613_v30 = vld [vmem:[%s3017_s16 + $0xf0] sm:$0xff]  ;;  %v659_v41 = vsub.f32 %v627_v17, %v3274_v9 }
  0xa3   : > { %v629_v2 = vadd.f32 %v597_v53, %v501_v43 }
  0xa4   : > { %725 = vadd.xlane.f32.xlu1 %v686_v42  ;;  %v548_v42 = vld [vmem:[%s3011_s26 + $0xe8] sm:$0xff]  ;;  %v628_v26 = vadd.f32 %v596_v6, %v500_v61 }
  0xa5   : > { %759 = vadd.xlane.f32.xlu0 %v703_v3  ;;  %v3265_v58 = vmul.f32 %v3055_v1, %v548_v42  ;;  %v532_v3 = vld [vmem:[%s3011_s26 + $0x68] sm:$0xff]  ;;  %v645_v42 = vadd.f32 %v613_v30, %v517_v19  ;;  %v661_v13 = vsub.f32 %v629_v2, %v3305_v63 }
  0xa6   : > { %v3282_v23 = vmul.f32 %v3055_v1, %v532_v3 }
  0xa7   : > { %v676_v21 = vsub.f32 %v644_v59, %v3265_v58  ;;  %v691_v59 = vmul.f32 %v659_v41, %v659_v41  ;;  %v677_v61 = vsub.f32 %v645_v42, %v3293_v39  ;;  %v693_v19 = vmul.f32 %v661_v13, %v661_v13 }
  0xa8   : > { %761 = vadd.xlane.f32.xlu1 %v704_v11  ;;  %v689_v11 = vmul.f32 %v657_v49, %v657_v49  ;;  %v502_v49 = vmul.f32 %v3055_v1, %v464_v37 }
  0xa9   : > { %727 = vadd.xlane.f32.xlu0 %v687_v27  ;;  %v518_v27 = vmul.f32 %v3055_v1, %v480_v7  ;;  %v708_v44 = vmul.f32 %v676_v21, %v676_v21  ;;  %v3309_v7 = vmul.f32 %v3055_v1, %v534_v55  ;;  %v2765_v21 = vmov 0  }
  0xaa   : > { %2394 = vset.pattern.permute.xlu0 %v2765_v21  ;;  %2395 = vset.pattern.permute.xlu1 %v2765_v21  ;;  %v1016_v21 = vld [vmem:[%s3044_s3 + $0x88] sm:$0xff] }
  0xac   : > { %729 = vadd.xlane.f32.xlu1 %v688_v35  ;;  %v614_v35 = vld [vmem:[%s3017_s16 + $0xf8] sm:$0xff] }
  0xad   : > { %763 = vadd.xlane.f32.xlu0 %v705_v46  ;;  %v660_v46 = vsub.f32 %v628_v26, %v3282_v23  ;;  %v646_v48 = vadd.f32 %v614_v35, %v518_v27 }
  0xaf   : > { %v692_v3 = vmul.f32 %v660_v46, %v660_v46  ;;  %v678_v6 = vsub.f32 %v646_v48, %v3290_v38  ;;  %v1015_v48 = vld [vmem:[%s3044_s3 + $0x80] sm:$0xff] }
  0xb0   : > { %765 = vadd.xlane.f32.xlu1 %v706_v57  ;;  %v598_v57 = vld [vmem:[%s3017_s16 + $0x78] sm:$0xff] }
  0xb1   : > { %731 = vadd.xlane.f32.xlu0 %v689_v11  ;;  %v709_v11 = vmul.f32 %v677_v61, %v677_v61  ;;  %v710_v17 = vmul.f32 %v678_v6, %v678_v6 }
  0xb4   : > { %733 = vadd.xlane.f32.xlu1 %v690_v8  ;;  %v630_v8 = vadd.f32 %v598_v57, %v502_v49  ;;  %v999_v57 = vld [vmem:[%s3044_s3] sm:$0xff] }
  0xb5   : > { %767 = vadd.xlane.f32.xlu0 %v707_v40 }
  0xb6   : > { %v662_v18 = vsub.f32 %v630_v8, %v3309_v7 }
  0xb8   : > { %769 = vadd.xlane.f32.xlu1 %v708_v44  ;;  %v694_v20 = vmul.f32 %v662_v18, %v662_v18 }
  0xb9   : > { %735 = vadd.xlane.f32.xlu0 %v691_v59 }
  0xbc   : > { %737 = vadd.xlane.f32.xlu1 %v692_v3 }
  0xbd   : > { %771 = vadd.xlane.f32.xlu0 %v709_v11 }
  0xc0   : > { %773 = vadd.xlane.f32.xlu1 %v710_v17 }
  0xc1   : > { %739 = vadd.xlane.f32.xlu0 %v693_v19 }
  0xc4   : > { %741 = vadd.xlane.f32.xlu1 %v694_v20 }
 0x112   : > { %v744_v1 = vpop.xlane.xlu0 %743 }
 0x113   : > { %2396 = vrsqrt.f32 %v744_v1  ;;  %vm889_vm0 = vcmp.eq.f32.partialorder %v744_v1, inf  ;;  %vm891_vm1 = vcmp.eq.f32.partialorder %v744_v1, 0.0  ;;  %v892_v37 = vand.u32 2147483648, %v744_v1 }
 0x115   : > { %v712_v26 = vpop.xlane.xlu1 %711 }
 0x116   : > { %2398 = vrsqrt.f32 %v712_v26  ;;  %v746_v27 = vpop.xlane.xlu0 %745  ;;  %vm777_vm2 = vcmp.eq.f32.partialorder %v712_v26, inf  ;;  %vm779_vm3 = vcmp.eq.f32.partialorder %v712_v26, 0.0  ;;  %v780_v41 = vand.u32 2147483648, %v712_v26 }
 0x117   : > { %2400 = vrsqrt.f32 %v746_v27  ;;  %vm896_vm4 = vcmp.eq.f32.partialorder %v746_v27, inf  ;;  %vm898_vm5 = vcmp.eq.f32.partialorder %v746_v27, 0.0  ;;  %v899_v44 = vand.u32 2147483648, %v746_v27 }
 0x119   : > { %v3313_v30 = vpop.xlane.xlu1 %713 }
 0x11a   : > { %2402 = vrsqrt.f32 %v3313_v30  ;;  %v3316_v34 = vpop.xlane.xlu0 %747  ;;  %vm784_vm6 = vcmp.eq.f32.partialorder %v3313_v30, inf  ;;  %vm786_vm7 = vcmp.eq.f32.partialorder %v3313_v30, 0.0  ;;  %v787_v52 = vand.u32 2147483648, %v3313_v30 }
 0x11b   : > { %2404 = vrsqrt.f32 %v3316_v34  ;;  %vm903_vm8 = vcmp.eq.f32.partialorder %v3316_v34, inf  ;;  %vm905_vm9 = vcmp.eq.f32.partialorder %v3316_v34, 0.0  ;;  %v906_v59 = vand.u32 2147483648, %v3316_v34 }
 0x11d   : > { %v3319_v35 = vpop.xlane.xlu1 %749  ;;  %v2397_v40 = vpop.eup %2396 }
 0x11e   : > { %2406 = vrsqrt.f32 %v3319_v35  ;;  %v888_v43 = vmul.f32 %v2397_v40, %v744_v1  ;;  %v3324_v46 = vpop.xlane.xlu0 %715  ;;  %vm910_vm10 = vcmp.eq.f32.partialorder %v3319_v35, inf  ;;  %vm912_vm11 = vcmp.eq.f32.partialorder %v3319_v35, 0.0 }
 0x11f   : > { %2408 = vrsqrt.f32 %v3324_v46  ;;  %v913_v6 = vand.u32 2147483648, %v3319_v35  ;;  %v794_v18 = vand.u32 2147483648, %v3324_v46  ;;  %vm791_vm14 = vcmp.eq.f32.partialorder %v3324_v46, inf }
 0x120   : > { %v2399_v42 = vpop.eup %2398  ;;  %v890_v55 = vsel %vm889_vm0, %v744_v1, %v888_v43  ;;  %vm793_vm0 = vcmp.eq.f32.partialorder %v3324_v46, 0.0 }
 0x121   : > { %v776_v49 = vmul.f32 %v2399_v42, %v712_v26  ;;  %v3330_v53 = vpop.xlane.xlu1 %717  ;;  %v2401_v61 = vpop.eup %2400  ;;  %v893_v2 = vsel %vm891_vm1, %v892_v37, %v890_v55 }
 0x122   : > { %2410 = vrsqrt.f32 %v3330_v53  ;;  %v1047_v11 = vmul.f32 %v1015_v48, %v893_v2  ;;  %v895_v17 = vmul.f32 %v2401_v61, %v746_v27  ;;  %v3344_v19 = vpop.xlane.xlu0 %751  ;;  %v801_v37 = vand.u32 2147483648, %v3330_v53 }
 0x123   : > { %v778_v3 = vsel %vm777_vm2, %v712_v26, %v776_v49  ;;  %2412 = vrsqrt.f32 %v3344_v19  ;;  %vm798_vm15 = vcmp.eq.f32.partialorder %v3330_v53, inf  ;;  %vm800_vm1 = vcmp.eq.f32.partialorder %v3330_v53, 0.0 }
 0x124   : > { %v2403_v8 = vpop.eup %2402  ;;  %v781_v13 = vsel %vm779_vm3, %v780_v41, %v778_v3  ;;  %vm1079_vm12 = vcmp.ge.f32.partialorder %v1047_v11, 0.0  ;;  %v1111_v42 = vmul.f32 0.2, %v1047_v11  ;;  %v897_v26 = vsel %vm896_vm4, %v746_v27, %v895_v17  ;;  %v1000_v41 = vld [vmem:[%s3044_s3 + $0x8] sm:$0xff]  ;;  %v1017_v17 = vld [vmem:[%s3044_s3 + $0x90] sm:$0xff] }
 0x125   : > { %v1031_v20 = vmul.f32 %v999_v57, %v781_v13  ;;  %v783_v1 = vmul.f32 %v2403_v8, %v3313_v30  ;;  %v3349_v40 = vpop.xlane.xlu1 %753  ;;  %v2405_v43 = vpop.eup %2404  ;;  %v900_v49 = vsel %vm898_vm5, %v899_v44, %v897_v26  ;;  %vm917_vm4 = vcmp.eq.f32.partialorder %v3344_v19, inf }
 0x126   : > { %2414 = vrsqrt.f32 %v3349_v40  ;;  %v1143_v61 = vsel %vm1079_vm12, %v1047_v11, %v1111_v42  ;;  %v1048_v2 = vmul.f32 %v1016_v21, %v900_v49  ;;  %v902_v8 = vmul.f32 %v2405_v43, %v3316_v34 }
 0x127   : > { %vm1063_vm13 = vcmp.ge.f32.partialorder %v1031_v20, 0.0  ;;  %v1095_v48 = vmul.f32 0.2, %v1031_v20  ;;  %v785_v55 = vsel %vm784_vm6, %v3313_v30, %v783_v1  ;;  %v1175_v27 = vsub.f32 0.0, %v1143_v61 }
 0x128   : > { %v2407_v57 = vpop.eup %2406  ;;  %v788_v3 = vsel %vm786_vm7, %v787_v52, %v785_v55  ;;  %vm1080_vm2 = vcmp.ge.f32.partialorder %v1048_v2, 0.0  ;;  %v1112_v11 = vmul.f32 0.2, %v1048_v2  ;;  %v904_v30 = vsel %vm903_vm8, %v3316_v34, %v902_v8 }
 0x129   : > { %v1127_v44 = vsel %vm1063_vm13, %v1031_v20, %v1095_v48  ;;  %v1032_v13 = vmul.f32 %v1000_v41, %v788_v3  ;;  %v909_v1 = vmul.f32 %v2407_v57, %v3319_v35  ;;  %v3371_v52 = vpop.xlane.xlu1 %721  ;;  %v2409_v21 = vpop.eup %2408  ;;  %v1223_v42 = vmul.f32 1.442695, %v1175_v27  ;;  %v1018_v57 = vld [vmem:[%s3044_s3 + $0x98] sm:$0xff] }
 0x12a   : > { %v1159_v26 = vsub.f32 0.0, %v1127_v44  ;;  %v907_v20 = vsel %vm905_vm9, %v906_v59, %v904_v30  ;;  %v1144_v49 = vsel %vm1080_vm2, %v1048_v2, %v1112_v11  ;;  %v3382_v44 = vpop.xlane.xlu0 %719  ;;  %vm924_vm6 = vcmp.eq.f32.partialorder %v3349_v40, inf }
 0x12b   : > { %vm1064_vm3 = vcmp.ge.f32.partialorder %v1032_v13, 0.0  ;;  %v1096_v43 = vmul.f32 0.2, %v1032_v13  ;;  %v1049_v55 = vmul.f32 %v1017_v17, %v907_v20  ;;  %v911_v61 = vsel %vm910_vm10, %v3319_v35, %v909_v1  ;;  %v1001_v20 = vld [vmem:[%s3044_s3 + $0x10] sm:$0xff] }
 0x12c   : > { %v2411_v41 = vpop.eup %2410  ;;  %v1191_v48 = vmul.f32 1.442695, %v1159_v26  ;;  %2416 = vpow2.f32 %v1223_v42  ;;  %v1176_v3 = vsub.f32 0.0, %v1144_v49  ;;  %v914_v27 = vsel %vm912_vm11, %v913_v6, %v911_v61 }
 0x12d   : > { %v1128_v8 = vsel %vm1064_vm3, %v1032_v13, %v1096_v43  ;;  %vm1081_vm5 = vcmp.ge.f32.partialorder %v1049_v55, 0.0  ;;  %v1113_v59 = vmul.f32 0.2, %v1049_v55  ;;  %v2413_v2 = vpop.eup %2412  ;;  %v1050_v26 = vmul.f32 %v1018_v57, %v914_v27  ;;  %v3388_v35 = vpop.xlane.xlu1 %757 }
 0x12e   : > { %2418 = vpow2.f32 %v1191_v48  ;;  %v1160_v34 = vsub.f32 0.0, %v1128_v8  ;;  %v1225_v17 = vmul.f32 1.442695, %v1176_v3  ;;  %v790_v1 = vmul.f32 %v2409_v21, %v3324_v46  ;;  %v1002_v48 = vld [vmem:[%s3044_s3 + $0x18] sm:$0xff]  ;;  %v3407_v8 = vpop.xlane.xlu0 %755 }
 0x12f   : > { %v797_v11 = vmul.f32 %v2411_v41, %v3330_v53  ;;  %v1145_v42 = vsel %vm1081_vm5, %v1049_v55, %v1113_v59  ;;  %vm926_vm7 = vcmp.eq.f32.partialorder %v3349_v40, 0.0  ;;  %vm1082_vm8 = vcmp.ge.f32.partialorder %v1050_v26, 0.0 }
 0x130   : > { %v2415_v30 = vpop.eup %2414  ;;  %v1193_v13 = vmul.f32 1.442695, %v1160_v34  ;;  %2420 = vpow2.f32 %v1225_v17  ;;  %v1177_v6 = vsub.f32 0.0, %v1145_v42  ;;  %v1114_v43 = vmul.f32 0.2, %v1050_v26  ;;  %v1019_v42 = vld [vmem:[%s3044_s3 + $0xa0] sm:$0xff] }
 0x131   : > { %v792_v21 = vsel %vm791_vm14, %v3324_v46, %v790_v1  ;;  %v799_v41 = vsel %vm798_vm15, %v3330_v53, %v797_v11  ;;  %v923_v49 = vmul.f32 %v2415_v30, %v3349_v40  ;;  %v927_v46 = vand.u32 2147483648, %v3349_v40  ;;  %v3416_v1 = vpop.xlane.xlu1 %725 }
 0x132   : > { %2422 = vpow2.f32 %v1193_v13  ;;  %v1227_v55 = vmul.f32 1.442695, %v1177_v6  ;;  %v1146_v57 = vsel %vm1082_vm8, %v1050_v26, %v1114_v43  ;;  %v795_v61 = vsel %vm793_vm0, %v794_v18, %v792_v21  ;;  %v1020_v26 = vld [vmem:[%s3044_s3 + $0xa8] sm:$0xff] }
 0x133   : > { %v802_v3 = vsel %vm800_vm1, %v801_v37, %v799_v41  ;;  %v1178_v27 = vsub.f32 0.0, %v1146_v57  ;;  %v1033_v34 = vmul.f32 %v1001_v20, %v795_v61  ;;  %v925_v17 = vsel %vm924_vm6, %v3349_v40, %v923_v49  ;;  %v3428_v40 = vpop.xlane.xlu0 %723 }
 0x134   : > { %v1034_v59 = vmul.f32 %v1002_v48, %v802_v3  ;;  %2424 = vpow2.f32 %v1227_v55  ;;  %v916_v18 = vmul.f32 %v2413_v2, %v3344_v19  ;;  %vm919_vm9 = vcmp.eq.f32.partialorder %v3344_v19, 0.0 }
 0x135   : > { %v1229_v53 = vmul.f32 1.442695, %v1178_v27  ;;  %vm1065_vm10 = vcmp.ge.f32.partialorder %v1033_v34, 0.0  ;;  %v1097_v37 = vmul.f32 0.2, %v1033_v34  ;;  %v928_v13 = vsel %vm926_vm7, %v927_v46, %v925_v17  ;;  %v3431_v46 = vpop.xlane.xlu1 %761 }
 0x136   : > { %vm1066_vm11 = vcmp.ge.f32.partialorder %v1034_v59, 0.0  ;;  %v2417_v11 = vpop.eup %2416  ;;  %v1098_v30 = vmul.f32 0.2, %v1034_v59  ;;  %v918_v6 = vsel %vm917_vm4, %v3344_v19, %v916_v18  ;;  %v920_v2 = vand.u32 2147483648, %v3344_v19 }
 0x137   : > { %2426 = vpow2.f32 %v1229_v53  ;;  %v1129_v20 = vsel %vm1065_vm10, %v1033_v34, %v1097_v37  ;;  %v1052_v48 = vmul.f32 %v1020_v26, %v928_v13  ;;  %1369 = vperm.xlu0 %2394, %v2417_v11   ;;  %vm812_vm14 = vcmp.eq.f32.partialorder %v3371_v52, inf }
 0x138   : > { %v2419_v43 = vpop.eup %2418  ;;  %v1161_v21 = vsub.f32 0.0, %v1129_v20  ;;  %v1130_v41 = vsel %vm1066_vm11, %v1034_v59, %v1098_v30  ;;  %v921_v49 = vsel %vm919_vm9, %v920_v2, %v918_v6  ;;  %2428 = vrsqrt.f32 %v3371_v52  ;;  %v3434_v30 = vpop.xlane.xlu0 %759 }
 0x139   : > { %v1162_v55 = vsub.f32 0.0, %v1130_v41  ;;  %vm1084_vm12 = vcmp.ge.f32.partialorder %v1052_v48, 0.0  ;;  %v1116_v57 = vmul.f32 0.2, %v1052_v48  ;;  %v1051_v61 = vmul.f32 %v1019_v42, %v921_v49  ;;  %v3445_v2 = vpop.xlane.xlu1 %729  ;;  %v1004_v49 = vld [vmem:[%s3044_s3 + $0x28] sm:$0xff] }
 0x13a   : > { %v2421_v3 = vpop.eup %2420  ;;  %v1195_v27 = vmul.f32 1.442695, %v1161_v21  ;;  %2430 = vrsqrt.f32 %v3382_v44  ;;  %vm814_vm15 = vcmp.eq.f32.partialorder %v3371_v52, 0.0  ;;  %v815_v13 = vand.u32 2147483648, %v3371_v52 }
 0x13b   : > { %v1197_v17 = vmul.f32 1.442695, %v1162_v55  ;;  %v1148_v26 = vsel %vm1084_vm12, %v1052_v48, %v1116_v57  ;;  %vm1083_vm13 = vcmp.ge.f32.partialorder %v1051_v61, 0.0  ;;  %v1115_v59 = vmul.f32 0.2, %v1051_v61  ;;  %1374 = vperm.xlu1 %2395, %v2421_v3  }
 0x13c   : > { %v2423_v34 = vpop.eup %2422  ;;  %2432 = vpow2.f32 %v1195_v27  ;;  %v1180_v19 = vsub.f32 0.0, %v1148_v26  ;;  %vm805_vm0 = vcmp.eq.f32.partialorder %v3382_v44, inf  ;;  %vm807_vm1 = vcmp.eq.f32.partialorder %v3382_v44, 0.0  ;;  %v3460_v57 = vpop.xlane.xlu0 %727  ;;  %v1003_v26 = vld [vmem:[%s3044_s3 + $0x20] sm:$0xff] }
 0x13d   : > { %2434 = vpow2.f32 %v1197_v17  ;;  %v1147_v18 = vsel %vm1083_vm13, %v1051_v61, %v1115_v59  ;;  %v808_v20 = vand.u32 2147483648, %v3382_v44  ;;  %vm938_vm2 = vcmp.eq.f32.partialorder %v3388_v35, inf }
 0x13e   : > { %v2425_v53 = vpop.eup %2424  ;;  %v1233_v37 = vmul.f32 1.442695, %v1180_v19  ;;  %v1179_v11 = vsub.f32 0.0, %v1147_v18  ;;  %2436 = vrsqrt.f32 %v3388_v35  ;;  %vm940_vm3 = vcmp.eq.f32.partialorder %v3388_v35, 0.0 }
 0x13f   : > { %2438 = vrsqrt.f32 %v3407_v8  ;;  %1289 = vperm.xlu1 %2395, %v2419_v43   ;;  %v941_v48 = vand.u32 2147483648, %v3388_v35  ;;  %vm931_vm4 = vcmp.eq.f32.partialorder %v3407_v8, inf  ;;  %vm933_vm5 = vcmp.eq.f32.partialorder %v3407_v8, 0.0 }
 0x140   : > { %2440 = vpow2.f32 %v1233_v37  ;;  %v1231_v6 = vmul.f32 1.442695, %v1179_v11  ;;  %v934_v55 = vand.u32 2147483648, %v3407_v8  ;;  %vm826_vm6 = vcmp.eq.f32.partialorder %v3416_v1, inf }
 0x141   : > { %v3440_v42 = vpop.eup %2426  ;;  %2442 = vrsqrt.f32 %v3416_v1  ;;  %vm828_vm7 = vcmp.eq.f32.partialorder %v3416_v1, 0.0  ;;  %v829_v27 = vand.u32 2147483648, %v3416_v1  ;;  %vm819_vm8 = vcmp.eq.f32.partialorder %v3428_v40, inf }
 0x142   : > { %v2429_v43 = vpop.eup %2428  ;;  %2444 = vrsqrt.f32 %v3428_v40  ;;  %vm821_vm9 = vcmp.eq.f32.partialorder %v3428_v40, 0.0  ;;  %vm952_vm11 = vcmp.eq.f32.partialorder %v3431_v46, inf  ;;  %vm954_vm13 = vcmp.eq.f32.partialorder %v3431_v46, 0.0 }
 0x143   : > { %v811_v21 = vmul.f32 %v2429_v43, %v3371_v52  ;;  %1294 = vperm.xlu1 %2395, %v2423_v34   ;;  %2446 = vrsqrt.f32 %v3431_v46 }
 0x144   : > { %v2431_v41 = vpop.eup %2430  ;;  %2448 = vpow2.f32 %v1231_v6 }
 0x145   : > { %v813_v61 = vsel %vm812_vm14, %v3371_v52, %v811_v21  ;;  %v804_v3 = vmul.f32 %v2431_v41, %v3382_v44  ;;  %2450 = vrsqrt.f32 %v3434_v30  ;;  %v3483_v52 = vpop.xlane.xlu1 %765  ;;  %v3497_v21 = vpop.xlane.xlu0 %763  ;;  %vm945_vm14 = vcmp.eq.f32.partialorder %v3434_v30, inf }
 0x146   : > { %v3467_v34 = vpop.eup %2432  ;;  %v816_v17 = vsel %vm814_vm15, %v815_v13, %v813_v61  ;;  %2452 = vrsqrt.f32 %v3445_v2  ;;  %vm947_vm15 = vcmp.eq.f32.partialorder %v3434_v30, 0.0 }
 0x147   : > { %v3475_v19 = vpop.eup %2434  ;;  %v1036_v18 = vmul.f32 %v1004_v49, %v816_v17  ;;  %v806_v37 = vsel %vm805_vm0, %v3382_v44, %v804_v3  ;;  %1379 = vperm.xlu1 %2395, %v2425_v53   ;;  %2454 = vrsqrt.f32 %v3460_v57  ;;  %v1022_v17 = vld [vmem:[%s3044_s3 + $0xb8] sm:$0xff]  ;;  %vm840_vm0 = vcmp.eq.f32.partialorder %v3445_v2, inf }
 0x148   : > { %v2437_v13 = vpop.eup %2436  ;;  %v809_v6 = vsel %vm807_vm1, %v808_v20, %v806_v37  ;;  %2456 = vrsqrt.f32 %v3483_v52  ;;  %vm842_vm1 = vcmp.eq.f32.partialorder %v3445_v2, 0.0 }
 0x149   : > { %v2439_v41 = vpop.eup %2438  ;;  %vm1068_vm10 = vcmp.ge.f32.partialorder %v1036_v18, 0.0  ;;  %v1100_v49 = vmul.f32 0.2, %v1036_v18  ;;  %v1035_v61 = vmul.f32 %v1003_v26, %v809_v6  ;;  %v937_v3 = vmul.f32 %v2437_v13, %v3388_v35  ;;  %v1021_v6 = vld [vmem:[%s3044_s3 + $0xb0] sm:$0xff] }
 0x14a   : > { %v2441_v53 = vpop.eup %2440  ;;  %v930_v44 = vmul.f32 %v2439_v41, %v3407_v8  ;;  %2458 = vrsqrt.f32 %v3497_v21 }
 0x14b   : > { %v2443_v43 = vpop.eup %2442  ;;  %v1132_v11 = vsel %vm1068_vm10, %v1036_v18, %v1100_v49  ;;  %vm1067_vm12 = vcmp.ge.f32.partialorder %v1035_v61, 0.0  ;;  %v1099_v26 = vmul.f32 0.2, %v1035_v61  ;;  %v939_v13 = vsel %vm938_vm2, %v3388_v35, %v937_v3  ;;  %1394 = vperm.xlu0 %2394, %v2441_v53   ;;  %1384 = vperm.xlu1 %2395, %v3440_v42  }
 0x14c   : > { %v1164_v41 = vsub.f32 0.0, %v1132_v11  ;;  %v942_v37 = vsel %vm940_vm3, %v941_v48, %v939_v13  ;;  %v932_v18 = vsel %vm931_vm4, %v3407_v8, %v930_v44  ;;  %v825_v49 = vmul.f32 %v2443_v43, %v3416_v1  ;;  %v2445_v3 = vpop.eup %2444  ;;  %v1006_v44 = vld [vmem:[%s3044_s3 + $0x38] sm:$0xff]  ;;  %v1005_v13 = vld [vmem:[%s3044_s3 + $0x30] sm:$0xff] }
 0x14d   : > { %v1131_v20 = vsel %vm1067_vm12, %v1035_v61, %v1099_v26  ;;  %v1054_v59 = vmul.f32 %v1022_v17, %v942_v37  ;;  %v935_v53 = vsel %vm933_vm5, %v934_v55, %v932_v18  ;;  %v2447_v35 = vpop.eup %2446  ;;  %v818_v17 = vmul.f32 %v2445_v3, %v3428_v40 }
 0x14e   : > { %v1201_v42 = vmul.f32 1.442695, %v1164_v41  ;;  %v1163_v48 = vsub.f32 0.0, %v1131_v20  ;;  %v1053_v11 = vmul.f32 %v1021_v6, %v935_v53  ;;  %v827_v43 = vsel %vm826_vm6, %v3416_v1, %v825_v49  ;;  %v2449_v61 = vpop.eup %2448 }
 0x14f   : > { %vm1086_vm2 = vcmp.ge.f32.partialorder %v1054_v59, 0.0  ;;  %v1118_v8 = vmul.f32 0.2, %v1054_v59  ;;  %v830_v55 = vsel %vm828_vm7, %v829_v27, %v827_v43  ;;  %1299 = vperm.xlu1 %2395, %v3467_v34   ;;  %v2451_v20 = vpop.eup %2450  ;;  %vm833_vm4 = vcmp.eq.f32.partialorder %v3460_v57, inf }
 0x150   : > { %2460 = vpow2.f32 %v1201_v42  ;;  %v1199_v37 = vmul.f32 1.442695, %v1163_v48  ;;  %vm1085_vm3 = vcmp.ge.f32.partialorder %v1053_v11, 0.0  ;;  %v1117_v26 = vmul.f32 0.2, %v1053_v11  ;;  %v2453_v6 = vpop.eup %2452 }
 0x151   : > { %v1150_v41 = vsel %vm1086_vm2, %v1054_v59, %v1118_v8  ;;  %v1038_v18 = vmul.f32 %v1006_v44, %v830_v55  ;;  %v820_v1 = vsel %vm819_vm8, %v3428_v40, %v818_v17  ;;  %v951_v27 = vmul.f32 %v2447_v35, %v3431_v46  ;;  %v2455_v34 = vpop.eup %2454  ;;  %v1024_v8 = vld [vmem:[%s3044_s3 + $0xc8] sm:$0xff] }
 0x152   : > { %vm835_vm5 = vcmp.eq.f32.partialorder %v3460_v57, 0.0  ;;  %2462 = vpow2.f32 %v1199_v37  ;;  %v1182_v49 = vsub.f32 0.0, %v1150_v41  ;;  %v1149_v3 = vsel %vm1085_vm3, %v1053_v11, %v1117_v26  ;;  %v2457_v35 = vpop.eup %2456 }
 0x153   : > { %v4111_v53 = vand.u32 2147483648, %v3428_v40  ;;  %v1181_v59 = vsub.f32 0.0, %v1149_v3  ;;  %vm1070_vm6 = vcmp.ge.f32.partialorder %v1038_v18, 0.0  ;;  %v1102_v48 = vmul.f32 0.2, %v1038_v18  ;;  %1304 = vperm.xlu1 %2395, %v3475_v19   ;;  %v3549_v19 = vpop.xlane.xlu1 %733 }
 0x154   : > { %vm966_vm7 = vcmp.eq.f32.partialorder %v3483_v52, inf  ;;  %v1237_v43 = vmul.f32 1.442695, %v1182_v49  ;;  %v953_v11 = vsel %vm952_vm11, %v3431_v46, %v951_v27  ;;  %v944_v55 = vmul.f32 %v2451_v20, %v3434_v30 }
 0x155   : > { %v823_v42 = vsel %vm821_vm9, %v4111_v53, %v820_v1  ;;  %v839_v40 = vmul.f32 %v2453_v6, %v3445_v2  ;;  %v1235_v17 = vmul.f32 1.442695, %v1181_v59  ;;  %v1134_v37 = vsel %vm1070_vm6, %v1038_v18, %v1102_v48  ;;  %v2459_v6 = vpop.eup %2458 }
 0x156   : > { %v1037_v44 = vmul.f32 %v1005_v13, %v823_v42  ;;  %v1023_v13 = vld [vmem:[%s3044_s3 + $0xc0] sm:$0xff]  ;;  %vm968_vm9 = vcmp.eq.f32.partialorder %v3483_v52, 0.0  ;;  %2464 = vpow2.f32 %v1237_v43  ;;  %v1166_v41 = vsub.f32 0.0, %v1134_v37 }
 0x157   : > { %v4112_v1 = vand.u32 2147483648, %v3431_v46  ;;  %v946_v20 = vsel %vm945_vm14, %v3434_v30, %v944_v55  ;;  %2466 = vpow2.f32 %v1235_v17  ;;  %v4113_v3 = vand.u32 2147483648, %v3434_v30  ;;  %1389 = vperm.xlu1 %2395, %v2449_v61   ;;  %v1008_v46 = vld [vmem:[%s3044_s3 + $0x48] sm:$0xff]  ;;  %v1007_v37 = vld [vmem:[%s3044_s3 + $0x40] sm:$0xff] }
 0x158   : > { %vm1069_vm8 = vcmp.ge.f32.partialorder %v1037_v44, 0.0  ;;  %v1101_v26 = vmul.f32 0.2, %v1037_v44  ;;  %v1205_v42 = vmul.f32 1.442695, %v1166_v41  ;;  %v841_v43 = vsel %vm840_vm0, %v3445_v2, %v839_v40 }
 0x159   : > { %v956_v27 = vsel %vm954_vm13, %v4112_v1, %v953_v11  ;;  %v949_v53 = vsel %vm947_vm15, %v4113_v3, %v946_v20  ;;  %v832_v30 = vmul.f32 %v2455_v34, %v3460_v57  ;;  %v3578_v1 = vpop.xlane.xlu1 %769  ;;  %vm959_vm13 = vcmp.eq.f32.partialorder %v3497_v21, inf }
 0x15a   : > { %v1133_v18 = vsel %vm1069_vm8, %v1037_v44, %v1101_v26  ;;  %v1056_v49 = vmul.f32 %v1024_v8, %v956_v27  ;;  %v1055_v48 = vmul.f32 %v1023_v13, %v949_v53  ;;  %v4114_v44 = vand.u32 2147483648, %v3445_v2  ;;  %v2461_v55 = vpop.eup %2460  ;;  %v3572_v26 = vpop.xlane.xlu0 %731 }
 0x15b   : > { %v1165_v59 = vsub.f32 0.0, %v1133_v18  ;;  %2468 = vpow2.f32 %v1205_v42  ;;  %v834_v40 = vsel %vm833_vm4, %v3460_v57, %v832_v30  ;;  %v965_v2 = vmul.f32 %v2457_v35, %v3483_v52  ;;  %1314 = vperm.xlu0 %2394, %v2461_v55  }
 0x15c   : > { %vm1088_vm10 = vcmp.ge.f32.partialorder %v1056_v49, 0.0  ;;  %v1120_v11 = vmul.f32 0.2, %v1056_v49  ;;  %v844_v8 = vsel %vm842_vm1, %v4114_v44, %v841_v43  ;;  %vm1087_vm11 = vcmp.ge.f32.partialorder %v1055_v48, 0.0  ;;  %v2463_v34 = vpop.eup %2462 }
 0x15d   : > { %v1203_v61 = vmul.f32 1.442695, %v1165_v59  ;;  %v1119_v17 = vmul.f32 0.2, %v1055_v48  ;;  %v1040_v41 = vmul.f32 %v1008_v46, %v844_v8  ;;  %v4115_v18 = vand.u32 2147483648, %v3460_v57  ;;  %1309 = vperm.xlu1 %2395, %v2463_v34   ;;  %v1026_v46 = vld [vmem:[%s3044_s3 + $0xd8] sm:$0xff] }
 0x15e   : > { %v1152_v13 = vsel %vm1088_vm10, %v1056_v49, %v1120_v11  ;;  %v967_v35 = vsel %vm966_vm7, %v3483_v52, %v965_v2  ;;  %v958_v43 = vmul.f32 %v2459_v6, %v3497_v21  ;;  %v4116_v30 = vand.u32 2147483648, %v3483_v52  ;;  %v1025_v34 = vld [vmem:[%s3044_s3 + $0xd0] sm:$0xff] }
 0x15f   : > { %2470 = vpow2.f32 %v1203_v61  ;;  %v1184_v27 = vsub.f32 0.0, %v1152_v13  ;;  %v1151_v20 = vsel %vm1087_vm11, %v1055_v48, %v1119_v17  ;;  %v837_v49 = vsel %vm835_vm5, %v4115_v18, %v834_v40  ;;  %v3595_v17 = vpop.xlane.xlu0 %767 }
 0x160   : > { %v1183_v3 = vsub.f32 0.0, %v1151_v20  ;;  %vm1072_vm12 = vcmp.ge.f32.partialorder %v1040_v41, 0.0  ;;  %v1104_v53 = vmul.f32 0.2, %v1040_v41  ;;  %v1039_v42 = vmul.f32 %v1007_v37, %v837_v49  ;;  %v2465_v44 = vpop.eup %2464 }
 0x161   : > { %v1241_v59 = vmul.f32 1.442695, %v1184_v27  ;;  %v970_v55 = vsel %vm968_vm9, %v4116_v30, %v967_v35  ;;  %v960_v61 = vsel %vm959_vm13, %v3497_v21, %v958_v43  ;;  %v2467_v6 = vpop.eup %2466  ;;  %vm961_vm15 = vcmp.eq.f32.partialorder %v3497_v21, 0.0  ;;  %1404 = vperm.xlu0 %2394, %v2465_v44  }
 0x162   : > { %v1239_v48 = vmul.f32 1.442695, %v1183_v3  ;;  %v1136_v11 = vsel %vm1072_vm12, %v1040_v41, %v1104_v53  ;;  %vm1071_vm14 = vcmp.ge.f32.partialorder %v1039_v42, 0.0  ;;  %v1103_v57 = vmul.f32 0.2, %v1039_v42  ;;  %v3598_v41 = vpop.xlane.xlu1 %737  ;;  %1399 = vperm.xlu1 %2395, %v2467_v6  }
 0x163   : > { %2472 = vpow2.f32 %v1241_v59  ;;  %v1168_v8 = vsub.f32 0.0, %v1136_v11  ;;  %v1058_v13 = vmul.f32 %v1026_v46, %v970_v55  ;;  %v962_v27 = vand.u32 2147483648, %v3497_v21  ;;  %v3604_v46 = vpop.xlane.xlu0 %735 }
 0x164   : > { %2474 = vpow2.f32 %v1239_v48  ;;  %v1135_v37 = vsel %vm1071_vm14, %v1039_v42, %v1103_v57  ;;  %vm854_vm2 = vcmp.eq.f32.partialorder %v3549_v19, inf  ;;  %vm856_vm3 = vcmp.eq.f32.partialorder %v3549_v19, 0.0 }
 0x165   : > { %v1209_v40 = vmul.f32 1.442695, %v1168_v8  ;;  %v1167_v2 = vsub.f32 0.0, %v1135_v37  ;;  %2476 = vrsqrt.f32 %v3549_v19  ;;  %vm1090_vm0 = vcmp.ge.f32.partialorder %v1058_v13, 0.0  ;;  %v2469_v20 = vpop.eup %2468 }
 0x166   : > { %v1122_v52 = vmul.f32 0.2, %v1058_v13  ;;  %v963_v49 = vsel %vm961_vm15, %v962_v27, %v960_v61  ;;  %1324 = vperm.xlu0 %2394, %v2469_v20   ;;  %v3607_v35 = vpop.xlane.xlu1 %773  ;;  %v857_v8 = vand.u32 2147483648, %v3549_v19  ;;  %vm847_vm4 = vcmp.eq.f32.partialorder %v3572_v26, inf }
 0x167   : > { %2478 = vpow2.f32 %v1209_v40  ;;  %v1207_v18 = vmul.f32 1.442695, %v1167_v2  ;;  %v1057_v53 = vmul.f32 %v1025_v34, %v963_v49  ;;  %vm849_vm5 = vcmp.eq.f32.partialorder %v3572_v26, 0.0  ;;  %v3618_v6 = vpop.xlane.xlu0 %771  ;;  %v1010_v2 = vld [vmem:[%s3044_s3 + $0x58] sm:$0xff] }
 0x168   : > { %v1154_v3 = vsel %vm1090_vm0, %v1058_v13, %v1122_v52  ;;  %2480 = vrsqrt.f32 %v3572_v26  ;;  %v850_v61 = vand.u32 2147483648, %v3572_v26  ;;  %vm980_vm6 = vcmp.eq.f32.partialorder %v3578_v1, inf }
 0x169   : > { %v2471_v42 = vpop.eup %2470  ;;  %2482 = vpow2.f32 %v1207_v18  ;;  %v1186_v59 = vsub.f32 0.0, %v1154_v3  ;;  %vm1089_vm1 = vcmp.ge.f32.partialorder %v1057_v53, 0.0  ;;  %v1121_v21 = vmul.f32 0.2, %v1057_v53 }
 0x16a   : > { %2484 = vrsqrt.f32 %v3578_v1  ;;  %1319 = vperm.xlu1 %2395, %v2471_v42   ;;  %vm982_vm7 = vcmp.eq.f32.partialorder %v3578_v1, 0.0  ;;  %v3624_v13 = vpop.xlane.xlu1 %741  ;;  %v983_v34 = vand.u32 2147483648, %v3578_v1  ;;  %vm973_vm8 = vcmp.eq.f32.partialorder %v3595_v17, inf }
 0x16b   : > { %v1245_v43 = vmul.f32 1.442695, %v1186_v59  ;;  %2486 = vrsqrt.f32 %v3595_v17  ;;  %v1153_v48 = vsel %vm1089_vm1, %v1057_v53, %v1121_v21  ;;  %vm975_vm9 = vcmp.eq.f32.partialorder %v3595_v17, 0.0  ;;  %v1009_v59 = vld [vmem:[%s3044_s3 + $0x50] sm:$0xff] }
 0x16c   : > { %v1185_v57 = vsub.f32 0.0, %v1153_v48  ;;  %v976_v20 = vand.u32 2147483648, %v3595_v17  ;;  %vm868_vm10 = vcmp.eq.f32.partialorder %v3598_v41, inf  ;;  %vm870_vm11 = vcmp.eq.f32.partialorder %v3598_v41, 0.0 }
 0x16d   : > { %v2473_v11 = vpop.eup %2472  ;;  %2488 = vpow2.f32 %v1245_v43  ;;  %v871_v21 = vand.u32 2147483648, %v3598_v41  ;;  %vm861_vm12 = vcmp.eq.f32.partialorder %v3604_v46, inf  ;;  %vm863_vm13 = vcmp.eq.f32.partialorder %v3604_v46, 0.0 }
 0x16e   : > { %v2475_v44 = vpop.eup %2474  ;;  %2490 = vrsqrt.f32 %v3598_v41  ;;  %1414 = vperm.xlu0 %2394, %v2473_v11   ;;  %v1243_v55 = vmul.f32 1.442695, %v1185_v57  ;;  %v864_v11 = vand.u32 2147483648, %v3604_v46  ;;  %v997_v57 = vand.u32 2147483648, %v3607_v35 }
 0x16f   : > { %v2477_v30 = vpop.eup %2476  ;;  %2492 = vrsqrt.f32 %v3604_v46  ;;  %1409 = vperm.xlu1 %2395, %v2475_v44   ;;  %v3651_v44 = vpop.xlane.xlu0 %739  ;;  %vm994_vm15 = vcmp.eq.f32.partialorder %v3607_v35, inf  ;;  %vm987_vm0 = vcmp.eq.f32.partialorder %v3618_v6, inf  ;;  %vm996_vm1 = vcmp.eq.f32.partialorder %v3607_v35, 0.0 }
 0x170   : > { %v853_v37 = vmul.f32 %v2477_v30, %v3549_v19  ;;  %2494 = vrsqrt.f32 %v3607_v35 }
 0x171   : > { %v2479_v40 = vpop.eup %2478  ;;  %2496 = vpow2.f32 %v1243_v55  ;;  %v1028_v55 = vld [vmem:[%s3044_s3 + $0xe8] sm:$0xff] }
 0x172   : > { %v2481_v27 = vpop.eup %2480  ;;  %v855_v52 = vsel %vm854_vm2, %v3549_v19, %v853_v37  ;;  %2498 = vrsqrt.f32 %v3618_v6  ;;  %1334 = vperm.xlu0 %2394, %v2479_v40   ;;  %vm989_vm2 = vcmp.eq.f32.partialorder %v3618_v6, 0.0 }
 0x173   : > { %v2483_v18 = vpop.eup %2482  ;;  %v858_v49 = vsel %vm856_vm3, %v857_v8, %v855_v52  ;;  %v846_v3 = vmul.f32 %v2481_v27, %v3572_v26  ;;  %2500 = vrsqrt.f32 %v3624_v13  ;;  %v1012_v52 = vld [vmem:[%s3044_s3 + $0x68] sm:$0xff] }
 0x174   : > { %v2485_v53 = vpop.eup %2484  ;;  %v1042_v42 = vmul.f32 %v1010_v2, %v858_v49  ;;  %1329 = vperm.xlu1 %2395, %v2483_v18   ;;  %2502 = vrsqrt.f32 %v3651_v44 }
 0x175   : > { %v2487_v43 = vpop.eup %2486  ;;  %v848_v19 = vsel %vm847_vm4, %v3572_v26, %v846_v3  ;;  %v979_v48 = vmul.f32 %v2485_v53, %v3578_v1  ;;  %vm882_vm4 = vcmp.eq.f32.partialorder %v3624_v13, inf }
 0x176   : > { %vm1074_vm14 = vcmp.ge.f32.partialorder %v1042_v42, 0.0  ;;  %v1106_v8 = vmul.f32 0.2, %v1042_v42  ;;  %v851_v30 = vsel %vm849_vm5, %v850_v61, %v848_v19  ;;  %v972_v37 = vmul.f32 %v2487_v43, %v3595_v17 }
 0x177   : > { %v2489_v40 = vpop.eup %2488  ;;  %v1041_v2 = vmul.f32 %v1009_v59, %v851_v30  ;;  %v981_v27 = vsel %vm980_vm6, %v3578_v1, %v979_v48  ;;  %v878_v30 = vand.u32 2147483648, %v3651_v44  ;;  %vm884_vm6 = vcmp.eq.f32.partialorder %v3624_v13, 0.0 }
 0x178   : > { %v2491_v26 = vpop.eup %2490  ;;  %v1138_v61 = vsel %vm1074_vm14, %v1042_v42, %v1106_v8  ;;  %v984_v49 = vsel %vm982_vm7, %v983_v34, %v981_v27  ;;  %v974_v3 = vsel %vm973_vm8, %v3595_v17, %v972_v37  ;;  %1424 = vperm.xlu0 %2394, %v2489_v40   ;;  %v1027_v42 = vld [vmem:[%s3044_s3 + $0xe0] sm:$0xff]  ;;  %vm875_vm7 = vcmp.eq.f32.partialorder %v3651_v44, inf }
 0x179   : > { %v2493_v53 = vpop.eup %2492  ;;  %v1170_v59 = vsub.f32 0.0, %v1138_v61  ;;  %vm1073_vm3 = vcmp.ge.f32.partialorder %v1041_v2, 0.0  ;;  %v1105_v43 = vmul.f32 0.2, %v1041_v2  ;;  %v1060_v19 = vmul.f32 %v1028_v55, %v984_v49 }
 0x17a   : > { %v2495_v1 = vpop.eup %2494  ;;  %v977_v34 = vsel %vm975_vm9, %v976_v20, %v974_v3  ;;  %v867_v48 = vmul.f32 %v2491_v26, %v3598_v41  ;;  %v860_v8 = vmul.f32 %v2493_v53, %v3604_v46  ;;  %v1011_v20 = vld [vmem:[%s3044_s3 + $0x60] sm:$0xff]  ;;  %vm877_vm8 = vcmp.eq.f32.partialorder %v3651_v44, 0.0 }
 0x17b   : > { %v2497_v37 = vpop.eup %2496  ;;  %v1213_v40 = vmul.f32 1.442695, %v1170_v59  ;;  %v1137_v27 = vsel %vm1073_vm3, %v1041_v2, %v1105_v43  ;;  %vm1092_vm5 = vcmp.ge.f32.partialorder %v1060_v19, 0.0  ;;  %v1124_v55 = vmul.f32 0.2, %v1060_v19 }
 0x17c   : > { %v2499_v61 = vpop.eup %2498  ;;  %v1169_v49 = vsub.f32 0.0, %v1137_v27  ;;  %v1059_v18 = vmul.f32 %v1027_v42, %v977_v34  ;;  %v869_v17 = vsel %vm868_vm10, %v3598_v41, %v867_v48  ;;  %v862_v26 = vsel %vm861_vm12, %v3604_v46, %v860_v8  ;;  %1419 = vperm.xlu1 %2395, %v2497_v37  }
 0x17d   : > { %v2501_v2 = vpop.eup %2500  ;;  %2504 = vpow2.f32 %v1213_v40  ;;  %v1156_v3 = vsel %vm1092_vm5, %v1060_v19, %v1124_v55  ;;  %v872_v53 = vsel %vm870_vm11, %v871_v21, %v869_v17  ;;  %v865_v59 = vsel %vm863_vm13, %v864_v11, %v862_v26  ;;  %v1030_v21 = vld [vmem:[%s3044_s3 + $0xf8] sm:$0xff]  ;;  %v1029_v55 = vld [vmem:[%s3044_s3 + $0xf0] sm:$0xff] }
 0x17e   : > { %v1211_v43 = vmul.f32 1.442695, %v1169_v49  ;;  %v1188_v42 = vsub.f32 0.0, %v1156_v3  ;;  %vm1091_vm9 = vcmp.ge.f32.partialorder %v1059_v18, 0.0  ;;  %v1123_v34 = vmul.f32 0.2, %v1059_v18  ;;  %v2503_v49 = vpop.eup %2502 }
 0x17f   : > { %v1044_v48 = vmul.f32 %v1012_v52, %v872_v53  ;;  %v1043_v8 = vmul.f32 %v1011_v20, %v865_v59  ;;  %v993_v37 = vmul.f32 %v2495_v1, %v3607_v35  ;;  %v986_v40 = vmul.f32 %v2499_v61, %v3618_v6 }
 0x180   : > { %2506 = vpow2.f32 %v1211_v43  ;;  %v1249_v19 = vmul.f32 1.442695, %v1188_v42  ;;  %v1155_v41 = vsel %vm1091_vm9, %v1059_v18, %v1123_v34  ;;  %v881_v46 = vmul.f32 %v2501_v2, %v3624_v13  ;;  %v1014_v34 = vld [vmem:[%s3044_s3 + $0x78] sm:$0xff] }
 0x181   : > { %v1187_v11 = vsub.f32 0.0, %v1155_v41  ;;  %vm1076_vm10 = vcmp.ge.f32.partialorder %v1044_v48, 0.0  ;;  %v1108_v27 = vmul.f32 0.2, %v1044_v48  ;;  %vm1075_vm11 = vcmp.ge.f32.partialorder %v1043_v8, 0.0 }
 0x182   : > { %2508 = vpow2.f32 %v1249_v19  ;;  %v1107_v52 = vmul.f32 0.2, %v1043_v8  ;;  %v995_v1 = vsel %vm994_vm15, %v3607_v35, %v993_v37  ;;  %v988_v18 = vsel %vm987_vm0, %v3618_v6, %v986_v40  ;;  %v1013_v37 = vld [vmem:[%s3044_s3 + $0x70] sm:$0xff] }
 0x183   : > { %v1247_v61 = vmul.f32 1.442695, %v1187_v11  ;;  %v1140_v17 = vsel %vm1076_vm10, %v1044_v48, %v1108_v27  ;;  %v998_v20 = vsel %vm996_vm1, %v997_v57, %v995_v1  ;;  %v4117_v26 = vand.u32 2147483648, %v3618_v6 }
 0x184   : > { %v1172_v3 = vsub.f32 0.0, %v1140_v17  ;;  %v1139_v53 = vsel %vm1075_vm11, %v1043_v8, %v1107_v52  ;;  %v1062_v59 = vmul.f32 %v1030_v21, %v998_v20  ;;  %v883_v48 = vsel %vm882_vm4, %v3624_v13, %v881_v46 }
 0x185   : > { %v991_v2 = vsel %vm989_vm2, %v4117_v26, %v988_v18  ;;  %2510 = vpow2.f32 %v1247_v61  ;;  %v1171_v42 = vsub.f32 0.0, %v1139_v53  ;;  %v874_v35 = vmul.f32 %v2503_v49, %v3651_v44 }
 0x186   : > { %v1061_v43 = vmul.f32 %v1029_v55, %v991_v2  ;;  %v1217_v57 = vmul.f32 1.442695, %v1172_v3  ;;  %vm1094_vm12 = vcmp.ge.f32.partialorder %v1062_v59, 0.0  ;;  %v1126_v40 = vmul.f32 0.2, %v1062_v59 }
 0x187   : > { %v2505_v6 = vpop.eup %2504  ;;  %v1215_v19 = vmul.f32 1.442695, %v1171_v42  ;;  %v4118_v8 = vand.u32 2147483648, %v3624_v13  ;;  %v876_v11 = vsel %vm875_vm7, %v3651_v44, %v874_v35 }
 0x188   : > { %vm1093_vm13 = vcmp.ge.f32.partialorder %v1061_v43, 0.0  ;;  %v1125_v41 = vmul.f32 0.2, %v1061_v43  ;;  %2512 = vpow2.f32 %v1217_v57  ;;  %v1158_v46 = vsel %vm1094_vm12, %v1062_v59, %v1126_v40  ;;  %1344 = vperm.xlu0 %2394, %v2505_v6  }
 0x189   : > { %v886_v21 = vsel %vm884_vm6, %v4118_v8, %v883_v48  ;;  %v879_v55 = vsel %vm877_vm8, %v878_v30, %v876_v11  ;;  %2514 = vpow2.f32 %v1215_v19  ;;  %v1190_v49 = vsub.f32 0.0, %v1158_v46 }
 0x18a   : > { %v1046_v27 = vmul.f32 %v1014_v34, %v886_v21  ;;  %v1157_v52 = vsel %vm1093_vm13, %v1061_v43, %v1125_v41  ;;  %v1045_v1 = vmul.f32 %v1013_v37, %v879_v55  ;;  %v2507_v18 = vpop.eup %2506  ;;  %v1479_v6 = vlaneseq  ;;  %v1488_v41 = vld [vmem:[%s420_s18] sm:$0x3] }
 0x18b   : > { %v1189_v13 = vsub.f32 0.0, %v1157_v52  ;;  %v1253_v17 = vmul.f32 1.442695, %v1190_v49  ;;  %1339 = vperm.xlu1 %2395, %v2507_v18   ;;  %v2766_v49 = vmov 1.0  }
 0x18c   : > { %vm1078_vm14 = vcmp.ge.f32.partialorder %v1046_v27, 0.0  ;;  %v1110_v61 = vmul.f32 0.2, %v1046_v27  ;;  %vm1077_vm15 = vcmp.ge.f32.partialorder %v1045_v1, 0.0  ;;  %v1109_v20 = vmul.f32 0.2, %v1045_v1  ;;  %v2509_v26 = vpop.eup %2508 }
 0x18d   : > { %v1251_v2 = vmul.f32 1.442695, %v1189_v13  ;;  %2516 = vpow2.f32 %v1253_v17  ;;  %1434 = vperm.xlu0 %2394, %v2509_v26   ;;  %v3730_v19 = vshrl.u32 %v1479_v6, 7  ;;  %v2525_v26 = vld [vmem:[%s3017_s16 + $0x88] sm:$0xff] }
 0x18e   : > { %v1142_v3 = vsel %vm1078_vm14, %v1046_v27, %v1110_v61  ;;  %v1141_v44 = vsel %vm1077_vm15, %v1045_v1, %v1109_v20  ;;  %v2524_v61 = vld [vmem:[%s3017_s16 + $0x80] sm:$0xff] }
 0x18f   : > { %v1174_v53 = vsub.f32 0.0, %v1142_v3  ;;  %2518 = vpow2.f32 %v1251_v2  ;;  %v1173_v30 = vsub.f32 0.0, %v1141_v44  ;;  %v2511_v59 = vpop.eup %2510  ;;  %v1491_v8 = vsub.s32 0, %v3730_v19 }
 0x190   : > { %1429 = vperm.xlu1 %2395, %v2511_v59   ;;  %v1495_v21 = vsub.s32 1, %v3730_v19  ;;  %v3740_v11 = vadd.s32 8, %v3730_v19  ;;  %v3747_v55 = vadd.s32 16, %v3730_v19  ;;  %v3764_v52 = vadd.s32 24, %v3730_v19 }
 0x191   : > { %v1221_v43 = vmul.f32 1.442695, %v1174_v53  ;;  %v1219_v42 = vmul.f32 1.442695, %v1173_v30  ;;  %v3742_v46 = vrot.slane %v1488_v41, %v1491_v8  ;;  %v3771_v1 = vadd.s32 32, %v3730_v19  ;;  %v2528_v8 = vld [vmem:[%s3017_s16 + $0x90] sm:$0xff] }
 0x192   : > { %v2513_v34 = vpop.eup %2512  ;;  %v3744_v27 = vrot.slane %v1488_v41, %v1495_v21  ;;  %v3778_v18 = vadd.s32 40, %v3730_v19  ;;  %v3785_v13 = vadd.s32 48, %v3730_v19  ;;  %v1271_v17 = vsub.f32 %v3061_v5, %v2524_v61  ;;  %v2529_v61 = vld [vmem:[%s3017_s16 + $0x98] sm:$0xff] }
 0x193   : > { %2520 = vpow2.f32 %v1221_v43  ;;  %v2515_v48 = vpop.eup %2514  ;;  %1354 = vperm.xlu0 %2394, %v2513_v34   ;;  %vm1497_vm1 = vcmp.eq.s32.totalorder %v3730_v19, %v3742_v46  ;;  %vm1499_vm3 = vcmp.eq.s32.totalorder %v3740_v11, %v3742_v46  ;;  %vm1501_vm5 = vcmp.eq.s32.totalorder %v3747_v55, %v3742_v46  ;;  %v2526_v43 = vld [vmem:[%s3017_s16] sm:$0xff]  ;;  %v2527_v34 = vld [vmem:[%s3017_s16 + $0x8] sm:$0xff] }
 0x194   : > { %2522 = vpow2.f32 %v1219_v42  ;;  %1349 = vperm.xlu1 %2395, %v2515_v48   ;;  %vm1498_vm0 = vcmp.eq.s32.totalorder %v3730_v19, %v3744_v27  ;;  %vm1500_vm2 = vcmp.eq.s32.totalorder %v3740_v11, %v3744_v27  ;;  %vm1502_vm4 = vcmp.eq.s32.totalorder %v3747_v55, %v3744_v27 }
 0x195   : > { %2078 = vmatprep.mubr.msk.f32.mxu1 %vm1498_vm0, %v2766_v49  ;;  %2062 = vmatprep.mubr.msk.f32.mxu0 %vm1498_vm0, %v2766_v49  ;;  %vm1504_vm6 = vcmp.eq.s32.totalorder %v3764_v52, %v3744_v27  ;;  %vm1503_vm7 = vcmp.eq.s32.totalorder %v3764_v52, %v3742_v46  ;;  %vm1506_vm8 = vcmp.eq.s32.totalorder %v3771_v1, %v3744_v27  ;;  %v3796_v3 = vadd.s32 56, %v3730_v19  ;;  %v1545_v52 = vld [vmem:[#allocation2] sm:$0xff] }
 0x196   : > { %vm1505_vm9 = vcmp.eq.s32.totalorder %v3771_v1, %v3742_v46  ;;  %vm1508_vm10 = vcmp.eq.s32.totalorder %v3778_v18, %v3744_v27  ;;  %vm1507_vm11 = vcmp.eq.s32.totalorder %v3778_v18, %v3742_v46  ;;  %v1272_v2 = vsub.f32 %v3075_v16, %v2525_v26 }
 0x197   : > { %v2517_v37 = vpop.eup %2516  ;;  %vm1510_vm12 = vcmp.eq.s32.totalorder %v3785_v13, %v3744_v27  ;;  %vm1509_vm13 = vcmp.eq.s32.totalorder %v3785_v13, %v3742_v46  ;;  %vm1512_vm14 = vcmp.eq.s32.totalorder %v3796_v3, %v3744_v27  ;;  %vm1511_vm15 = vcmp.eq.s32.totalorder %v3796_v3, %v3742_v46 }
 0x198   : > { %1444 = vperm.xlu0 %2394, %v2517_v37   ;;  %v1255_v42 = vsub.f32 %v3068_v10, %v2526_v43  ;;  %v1256_v48 = vsub.f32 %v3082_v22, %v2527_v34  ;;  %v1273_v21 = vsub.f32 %v3090_v29, %v2528_v8  ;;  %v1274_v10 = vsub.f32 %v3098_v36, %v2529_v61 }
 0x199   : > { %v2519_v35 = vpop.eup %2518 }
 0x19a   : > { %1439 = vperm.xlu1 %2395, %v2519_v35  }
 0x19d   : > { %v2521_v57 = vpop.eup %2520 }
 0x19e   : > { %v2523_v40 = vpop.eup %2522  ;;  %1364 = vperm.xlu0 %2394, %v2521_v57  }
 0x19f   : > { %1359 = vperm.xlu1 %2395, %v2523_v40  }
 0x1b6   : > { %v1370_v20 = vpop.permute.xlu0 %1369 }
 0x1b7   : > { %v1463_v53 = vmul.f32 %v1370_v20, %v1271_v17 }
 0x1ba   : > { %v1375_v44 = vpop.permute.xlu1 %1374 }
 0x1bb   : > { %v1464_v30 = vmul.f32 %v1375_v44, %v1272_v2  ;;  %v2248_v59 = vpack.c.bf16 %v1375_v44, %v1370_v20  ;;  %v2530_v44 = vld [vmem:[%s3017_s16 + $0x10] sm:$0xff] }
 0x1bd   : > { %2249 = vmatprep.subr.bf16.mxu1 %v2248_v59  ;;  %v2216_v5 = vpack.c.bf16 %v1464_v30, %v1463_v53  ;;  %v1257_v30 = vsub.f32 %v3110_v50, %v2530_v44  ;;  %v2531_v59 = vld [vmem:[%s3017_s16 + $0x18] sm:$0xff] }
 0x1be   : > { %v1290_v16 = vpop.permute.xlu1 %1289  ;;  %v1258_v29 = vsub.f32 %v3119_v60, %v2531_v59 }
 0x1bf   : > { %2217 = vmatprep.subr.bf16.mxu0 %v2216_v5  ;;  %v1447_v35 = vmul.f32 %v1290_v16, %v1255_v42  ;;  %v2532_v5 = vld [vmem:[%s3017_s16 + $0xa8] sm:$0xff] }
 0x1c2   : > { %v1295_v37 = vpop.permute.xlu1 %1294 }
 0x1c3   : > { %v1448_v57 = vmul.f32 %v1295_v37, %v1256_v48  ;;  %v2250_v40 = vpack.c.bf16 %v1295_v37, %v1290_v16  ;;  %v1276_v16 = vsub.f32 %v3131_v12, %v2532_v5  ;;  %v2533_v48 = vld [vmem:[%s3017_s16 + $0xa0] sm:$0xff] }
 0x1c4   : > { %v1275_v37 = vsub.f32 %v3134_v14, %v2533_v48 }
 0x1c5   : > { %2251 = vmatpush3.bf16.msra.mxu1 %v2250_v40  ;;  %v2218_v6 = vpack.c.bf16 %v1448_v57, %v1447_v35 }
 0x1c6   : > { %v1380_v41 = vpop.permute.xlu1 %1379 }
 0x1c7   : > { %2219 = vmatpush3.bf16.msra.mxu0 %v2218_v6  ;;  %v1465_v20 = vmul.f32 %v1380_v41, %v1273_v21  ;;  %v2535_v21 = vld [vmem:[%s3017_s16 + $0x20] sm:$0xff] }
 0x1c8   : > { %v1259_v61 = vsub.f32 %v3151_v32, %v2535_v21  ;;  %v2542_v21 = vld [vmem:[%s3017_s16 + $0x48] sm:$0xff] }
 0x1ca   : > { %v1385_v17 = vpop.permute.xlu1 %1384  ;;  %v1395_v35 = vpop.permute.xlu0 %1394 }
 0x1cb   : > { %v1466_v22 = vmul.f32 %v1385_v17, %v1274_v10  ;;  %v2252_v26 = vpack.c.bf16 %v1385_v17, %v1380_v41  ;;  %v1468_v40 = vmul.f32 %v1395_v35, %v1276_v16  ;;  %v2534_v41 = vld [vmem:[%s3017_s16 + $0x28] sm:$0xff]  ;;  %v2538_v16 = vld [vmem:[%s3017_s16 + $0x38] sm:$0xff] }
 0x1cc   : > { %v1260_v12 = vsub.f32 %v3148_v31, %v2534_v41 }
 0x1cd   : > { %v2220_v2 = vpack.c.bf16 %v1466_v22, %v1465_v20  ;;  %2253 = vmatprep.subr.bf16.mxu1 %v2252_v26  ;;  %v2536_v26 = vld [vmem:[%s3017_s16 + $0xb8] sm:$0xff] }
 0x1ce   : > { %v1300_v53 = vpop.permute.xlu1 %1299 }
 0x1cf   : > { %2221 = vmatprep.subr.bf16.mxu0 %v2220_v2  ;;  %v1449_v43 = vmul.f32 %v1300_v53, %v1257_v30  ;;  %v1278_v2 = vsub.f32 %v3171_v56, %v2536_v26 }
 0x1d2   : > { %v1305_v36 = vpop.permute.xlu1 %1304 }
 0x1d3   : > { %v1450_v42 = vmul.f32 %v1305_v36, %v1258_v29  ;;  %v2254_v34 = vpack.c.bf16 %v1305_v36, %v1300_v53  ;;  %v2537_v53 = vld [vmem:[%s3017_s16 + $0xb0] sm:$0xff]  ;;  %v1262_v36 = vsub.f32 %v3179_v0, %v2538_v16  ;;  %v2546_v16 = vld [vmem:[%s3017_s16 + $0x58] sm:$0xff] }
 0x1d4   : > { %v1277_v44 = vsub.f32 %v3162_v45, %v2537_v53  ;;  %v2544_v53 = vld [vmem:[%s3017_s16 + $0xd8] sm:$0xff] }
 0x1d5   : > { %v2222_v57 = vpack.c.bf16 %v1450_v42, %v1449_v43  ;;  %2255 = vmatpush3.bf16.msra.mxu1 %v2254_v34  ;;  %v2539_v43 = vld [vmem:[%s3017_s16 + $0x30] sm:$0xff] }
 0x1d6   : > { %v1390_v50 = vpop.permute.xlu1 %1389  ;;  %v1261_v42 = vsub.f32 %v3182_v4, %v2539_v43 }
 0x1d7   : > { %v1467_v6 = vmul.f32 %v1390_v50, %v1275_v37  ;;  %v2256_v60 = vpack.c.bf16 %v1395_v35, %v1390_v50  ;;  %2223 = vmatpush3.bf16.msra.mxu0 %v2222_v57  ;;  %v2540_v57 = vld [vmem:[%s3017_s16 + $0xc8] sm:$0xff] }
 0x1d8   : > { %v1280_v50 = vsub.f32 %v3201_v33, %v2540_v57  ;;  %v2549_v57 = vld [vmem:[%s3017_s16 + $0xe0] sm:$0xff] }
 0x1d9   : > { %v2224_v8 = vpack.c.bf16 %v1468_v40, %v1467_v6  ;;  %2257 = vmatprep.subr.bf16.mxu1 %v2256_v60  ;;  %v2541_v40 = vld [vmem:[%s3017_s16 + $0xc0] sm:$0xff] }
 0x1da   : > { %v1315_v10 = vpop.permute.xlu0 %1314  ;;  %v1279_v6 = vsub.f32 %v3196_v25, %v2541_v40 }
 0x1db   : > { %2225 = vmatprep.subr.bf16.mxu0 %v2224_v8  ;;  %v1452_v17 = vmul.f32 %v1315_v10, %v1260_v12 }
 0x1dc   : > { %v1310_v14 = vpop.permute.xlu1 %1309 }
 0x1dd   : > { %v1451_v20 = vmul.f32 %v1310_v14, %v1259_v61  ;;  %v2258_v22 = vpack.c.bf16 %v1315_v10, %v1310_v14  ;;  %v1264_v61 = vsub.f32 %v3219_v54, %v2542_v21  ;;  %v2543_v10 = vld [vmem:[%s3017_s16 + $0x40] sm:$0xff] }
 0x1de   : > { %v1263_v14 = vsub.f32 %v3212_v47, %v2543_v10 }
 0x1df   : > { %v2226_v31 = vpack.c.bf16 %v1452_v17, %v1451_v20  ;;  %2259 = vmatpush3.bf16.msra.mxu1 %v2258_v22 }
 0x1e0   : > { %v1405_v30 = vpop.permute.xlu0 %1404 }
 0x1e1   : > { %v1400_v59 = vpop.permute.xlu1 %1399  ;;  %2227 = vmatpush3.bf16.msra.mxu0 %v2226_v31  ;;  %v1470_v32 = vmul.f32 %v1405_v30, %v1278_v2  ;;  %v2545_v31 = vld [vmem:[%s3017_s16 + $0xd0] sm:$0xff] }
 0x1e2   : > { %v1469_v29 = vmul.f32 %v1400_v59, %v1277_v44  ;;  %v2260_v5 = vpack.c.bf16 %v1405_v30, %v1400_v59  ;;  %v1282_v44 = vsub.f32 %v3235_v15, %v2544_v53  ;;  %v1281_v54 = vsub.f32 %v3226_v62, %v2545_v31  ;;  %v2547_v15 = vld [vmem:[%s3017_s16 + $0x50] sm:$0xff] }
 0x1e3   : > { %v2555_v31 = vld [vmem:[%s3017_s16 + $0x70] sm:$0xff] }
 0x1e4   : > { %v2228_v34 = vpack.c.bf16 %v1470_v32, %v1469_v29  ;;  %2261 = vmatprep.subr.bf16.mxu1 %v2260_v5 }
 0x1e5   : > { %v1325_v56 = vpop.permute.xlu0 %1324 }
 0x1e6   : > { %2229 = vmatprep.subr.bf16.mxu0 %v2228_v34  ;;  %v1454_v48 = vmul.f32 %v1325_v56, %v1262_v36  ;;  %v1266_v36 = vsub.f32 %v3243_v24, %v2546_v16 }
 0x1e9   : > { %v1320_v45 = vpop.permute.xlu1 %1319 }
 0x1ea   : > { %v1453_v37 = vmul.f32 %v1320_v45, %v1261_v42  ;;  %v2262_v35 = vpack.c.bf16 %v1325_v56, %v1320_v45  ;;  %v1265_v42 = vsub.f32 %v3246_v28, %v2547_v15 }
 0x1ec   : > { %v2230_v0 = vpack.c.bf16 %v1454_v48, %v1453_v37  ;;  %2263 = vmatpush3.bf16.msra.mxu1 %v2262_v35  ;;  %v2548_v48 = vld [vmem:[%s3017_s16 + $0xe8] sm:$0xff] }
 0x1ed   : > { %v1415_v60 = vpop.permute.xlu0 %1414  ;;  %v1284_v37 = vsub.f32 %v3265_v58, %v2548_v48 }
 0x1ee   : > { %v1410_v4 = vpop.permute.xlu1 %1409  ;;  %2231 = vmatpush3.bf16.msra.mxu0 %v2230_v0  ;;  %v1472_v41 = vmul.f32 %v1415_v60, %v1280_v50  ;;  %v1283_v50 = vsub.f32 %v3260_v51, %v2549_v57 }
 0x1ef   : > { %v1471_v12 = vmul.f32 %v1410_v4, %v1279_v6  ;;  %v2264_v8 = vpack.c.bf16 %v1415_v60, %v1410_v4  ;;  %v2550_v6 = vld [vmem:[%s3017_s16 + $0x68] sm:$0xff] }
 0x1f0   : > { %v1268_v24 = vsub.f32 %v3282_v23, %v2550_v6  ;;  %v2552_v23 = vld [vmem:[%s3017_s16 + $0xf8] sm:$0xff] }
 0x1f1   : > { %v1335_v33 = vpop.permute.xlu0 %1334  ;;  %v2232_v17 = vpack.c.bf16 %v1472_v41, %v1471_v12  ;;  %2265 = vmatprep.subr.bf16.mxu1 %v2264_v8  ;;  %v2551_v41 = vld [vmem:[%s3017_s16 + $0x60] sm:$0xff] }
 0x1f2   : > { %v1456_v20 = vmul.f32 %v1335_v33, %v1264_v61  ;;  %v1267_v12 = vsub.f32 %v3274_v9, %v2551_v41  ;;  %v2554_v9 = vld [vmem:[%s3017_s16 + $0x78] sm:$0xff] }
 0x1f3   : > { %v1330_v25 = vpop.permute.xlu1 %1329  ;;  %2233 = vmatprep.subr.bf16.mxu0 %v2232_v17  ;;  %v1548_v41 = vld [vmem:[#allocation2 + $0x18] sm:$0xff] }
 0x1f4   : > { %v1455_v22 = vmul.f32 %v1330_v25, %v1263_v14  ;;  %v2266_v26 = vpack.c.bf16 %v1335_v33, %v1330_v25  ;;  %v1286_v14 = vsub.f32 %v3290_v38, %v2552_v23  ;;  %v2553_v33 = vld [vmem:[%s3017_s16 + $0xf0] sm:$0xff] }
 0x1f5   : > { %v1285_v17 = vsub.f32 %v3293_v39, %v2553_v33  ;;  %v1549_v33 = vld [vmem:[#allocation2 + $0x20] sm:$0xff] }
 0x1f6   : > { %v2234_v2 = vpack.c.bf16 %v1456_v20, %v1455_v22  ;;  %2267 = vmatpush3.bf16.msra.mxu1 %v2266_v26  ;;  %v1270_v22 = vsub.f32 %v3309_v7, %v2554_v9  ;;  %v1674_v7 = vld [vmem:[#allocation3] sm:$0xff] }
 0x1f7   : > { %v1425_v47 = vpop.permute.xlu0 %1424 }
 0x1f8   : > { %2235 = vmatpush3.bf16.msra.mxu0 %v2234_v2  ;;  %v1474_v59 = vmul.f32 %v1425_v47, %v1282_v44 }
 0x1fb   : > { %v1420_v30 = vpop.permute.xlu1 %1419 }
 0x1fc   : > { %v1473_v32 = vmul.f32 %v1420_v30, %v1281_v54  ;;  %v2268_v29 = vpack.c.bf16 %v1425_v47, %v1420_v30  ;;  %v1269_v54 = vsub.f32 %v3305_v63, %v2555_v31  ;;  %v1550_v31 = vld [vmem:[#allocation2 + $0x28] sm:$0xff] }
 0x1fe   : > { %v2236_v5 = vpack.c.bf16 %v1474_v59, %v1473_v32  ;;  %2269 = vmatprep.subr.bf16.mxu1 %v2268_v29 }
 0x200   : > { %2237 = vmatprep.subr.bf16.mxu0 %v2236_v5  ;;  %v1675_v5 = vld [vmem:[#allocation3 + $0x8] sm:$0xff] }
 0x207   : > { %v1345_v43 = vpop.permute.xlu0 %1344 }
 0x208   : > { %v1458_v56 = vmul.f32 %v1345_v43, %v1266_v36 }
 0x20a   : > { %v1340_v62 = vpop.permute.xlu1 %1339 }
 0x20b   : > { %v1457_v34 = vmul.f32 %v1340_v62, %v1265_v42  ;;  %v2270_v45 = vpack.c.bf16 %v1345_v43, %v1340_v62  ;;  %v1546_v42 = vld [vmem:[#allocation2 + $0x8] sm:$0xff] }
 0x20c   : > { %v1435_v35 = vpop.permute.xlu0 %1434 }
 0x20d   : > { %v2238_v40 = vpack.c.bf16 %v1458_v56, %v1457_v34  ;;  %2271 = vmatpush3.bf16.msra.mxu1 %v2270_v45  ;;  %v1476_v28 = vmul.f32 %v1435_v35, %v1284_v37  ;;  %v1676_v56 = vld [vmem:[#allocation3 + $0x10] sm:$0xff] }
 0x20f   : > { %v1430_v0 = vpop.permute.xlu1 %1429  ;;  %2239 = vmatpush3.bf16.msra.mxu0 %v2238_v40 }
 0x210   : > { %v1475_v60 = vmul.f32 %v1430_v0, %v1283_v50  ;;  %v2272_v4 = vpack.c.bf16 %v1435_v35, %v1430_v0  ;;  %v1547_v35 = vld [vmem:[#allocation2 + $0x10] sm:$0xff] }
 0x212   : > { %v1355_v58 = vpop.permute.xlu0 %1354  ;;  %v2240_v8 = vpack.c.bf16 %v1476_v28, %v1475_v60  ;;  %2273 = vmatprep.subr.bf16.mxu1 %v2272_v4 }
 0x213   : > { %v1350_v51 = vpop.permute.xlu1 %1349  ;;  %v1460_v21 = vmul.f32 %v1355_v58, %v1268_v24  ;;  %v1677_v24 = vld [vmem:[#allocation3 + $0x18] sm:$0xff] }
 0x214   : > { %v1459_v61 = vmul.f32 %v1350_v51, %v1267_v12  ;;  %v2274_v10 = vpack.c.bf16 %v1355_v58, %v1350_v51  ;;  %2241 = vmatprep.subr.bf16.mxu0 %v2240_v8 }
 0x216   : > { %v2242_v25 = vpack.c.bf16 %v1460_v21, %v1459_v61  ;;  %2275 = vmatpush3.bf16.msra.mxu1 %v2274_v10  ;;  %v1678_v21 = vld [vmem:[#allocation3 + $0x20] sm:$0xff] }
 0x217   : > { %v1445_v20 = vpop.permute.xlu0 %1444 }
 0x218   : > { %2243 = vmatpush3.bf16.msra.mxu0 %v2242_v25  ;;  %v1478_v2 = vmul.f32 %v1445_v20, %v1286_v14 }
 0x219   : > { %v1440_v26 = vpop.permute.xlu1 %1439 }
 0x21a   : > { %v1477_v53 = vmul.f32 %v1440_v26, %v1285_v17  ;;  %v2276_v44 = vpack.c.bf16 %v1445_v20, %v1440_v26 }
 0x21c   : > { %v2244_v30 = vpack.c.bf16 %v1478_v2, %v1477_v53  ;;  %2277 = vmatprep.subr.bf16.mxu1 %v2276_v44 }
 0x21d   : > { %v1365_v47 = vpop.permute.xlu0 %1364 }
 0x21e   : > { %v1360_v38 = vpop.permute.xlu1 %1359  ;;  %v1462_v59 = vmul.f32 %v1365_v47, %v1270_v22  ;;  %2245 = vmatprep.subr.bf16.mxu0 %v2244_v30  ;;  %v1679_v22 = vld [vmem:[#allocation3 + $0x28] sm:$0xff] }
 0x21f   : > { %v1461_v39 = vmul.f32 %v1360_v38, %v1269_v54  ;;  %v2278_v32 = vpack.c.bf16 %v1365_v47, %v1360_v38 }
 0x221   : > { %v2246_v29 = vpack.c.bf16 %v1462_v59, %v1461_v39  ;;  %2279 = vmatpush3.bf16.msra.mxu1 %v2278_v32  ;;  %v1680_v59 = vld [vmem:[#allocation3 + $0x30] sm:$0xff] }
 0x223   : > { %2247 = vmatpush3.bf16.msra.mxu0 %v2246_v29 }
 0x224   : > { %2079 = vmatmul.mubr.msk.f32.vlgmr.msra.gmra.mrb[0].mxu1 %vm1497_vm1, %v2766_v49 }
 0x225   : > { %2080 = vmatprep.mubr.msk.f32.mxu1 %vm1500_vm2, %v2766_v49 }
 0x226   : > { %2063 = vmatmul.mubr.msk.f32.vlgmr.msra.gmra.mrb[0].mxu0 %vm1497_vm1, %v2766_v49 }
 0x227   : > { %2064 = vmatprep.mubr.msk.f32.mxu0 %vm1500_vm2, %v2766_v49 }
 0x228   : > { %2081 = vmatmul.mubr.msk.f32.gmra.mrb[2].mxu1 %vm1499_vm3, %v2766_v49 }
 0x229   : > { %2082 = vmatprep.mubr.msk.f32.mxu1 %vm1502_vm4, %v2766_v49 }
 0x22a   : > { %2065 = vmatmul.mubr.msk.f32.gmra.mrb[2].mxu0 %vm1499_vm3, %v2766_v49 }
 0x22b   : > { %2066 = vmatprep.mubr.msk.f32.mxu0 %vm1502_vm4, %v2766_v49 }
 0x22c   : > { %2083 = vmatmul.mubr.msk.f32.gmra.mrb[4].mxu1 %vm1501_vm5, %v2766_v49 }
 0x22d   : > { %2084 = vmatprep.mubr.msk.f32.mxu1 %vm1504_vm6, %v2766_v49 }
 0x22e   : > { %2067 = vmatmul.mubr.msk.f32.gmra.mrb[4].mxu0 %vm1501_vm5, %v2766_v49 }
 0x22f   : > { %2068 = vmatprep.mubr.msk.f32.mxu0 %vm1504_vm6, %v2766_v49 }
 0x230   : > { %2085 = vmatmul.mubr.msk.f32.gmra.mrb[6].mxu1 %vm1503_vm7, %v2766_v49 }
 0x231   : > { %2086 = vmatprep.mubr.msk.f32.mxu1 %vm1506_vm8, %v2766_v49 }
 0x232   : > { %2069 = vmatmul.mubr.msk.f32.gmra.mrb[6].mxu0 %vm1503_vm7, %v2766_v49 }
 0x233   : > { %2070 = vmatprep.mubr.msk.f32.mxu0 %vm1506_vm8, %v2766_v49 }
 0x234   : > { %2087 = vmatmul.mubr.msk.f32.gmra.mrb[8].mxu1 %vm1505_vm9, %v2766_v49 }
 0x235   : > { %2088 = vmatprep.mubr.msk.f32.mxu1 %vm1508_vm10, %v2766_v49 }
 0x236   : > { %2071 = vmatmul.mubr.msk.f32.gmra.mrb[8].mxu0 %vm1505_vm9, %v2766_v49 }
 0x237   : > { %2072 = vmatprep.mubr.msk.f32.mxu0 %vm1508_vm10, %v2766_v49 }
 0x238   : > { %2089 = vmatmul.mubr.msk.f32.gmra.mrb[10].mxu1 %vm1507_vm11, %v2766_v49 }
 0x239   : > { %2090 = vmatprep.mubr.msk.f32.mxu1 %vm1510_vm12, %v2766_v49 }
 0x23a   : > { %2073 = vmatmul.mubr.msk.f32.gmra.mrb[10].mxu0 %vm1507_vm11, %v2766_v49 }
 0x23b   : > { %2074 = vmatprep.mubr.msk.f32.mxu0 %vm1510_vm12, %v2766_v49 }
 0x23c   : > { %2091 = vmatmul.mubr.msk.f32.gmra.mrb[12].mxu1 %vm1509_vm13, %v2766_v49 }
 0x23d   : > { %2092 = vmatprep.mubr.msk.f32.mxu1 %vm1512_vm14, %v2766_v49 }
 0x23e   : > { %2075 = vmatmul.mubr.msk.f32.gmra.mrb[12].mxu0 %vm1509_vm13, %v2766_v49 }
 0x23f   : > { %2076 = vmatprep.mubr.msk.f32.mxu0 %vm1512_vm14, %v2766_v49 }
 0x240   : > { %2093 = vmatmul.mubr.msk.f32.gmra.mrb[14].mxu1 %vm1511_vm15, %v2766_v49 }
 0x242   : > { %2077 = vmatmul.mubr.msk.f32.gmra.mrb[14].mxu0 %vm1511_vm15, %v2766_v49 }
 0x2f7   : > { %v2192_v63 = vpop.f32.mrb[0].mxu1 }
 0x2f8   : > { %v2193_v19 = vpop.f32.mrb[1].mxu1 }
 0x2f9   : > { %v2136_v11 = vpop.f32.mrb[0].mxu0  ;;  %v2194_v55 = vadd.f32 %v2193_v19, %v2192_v63 }
 0x2fa   : > { %v2137_v1 = vpop.f32.mrb[1].mxu0 }
 0x2fb   : > { %v1787_v18 = vadd.f32 %v2194_v55, %v1674_v7  ;;  %v2138_v27 = vadd.f32 %v2137_v1, %v2136_v11  ;;  %v2195_v13 = vpop.f32.mrb[2].mxu1  ;;  %v1551_v7 = vld [vmem:[#allocation2 + $0x30] sm:$0xff]  ;;  %v1681_v1 = vld [vmem:[#allocation3 + $0x38] sm:$0xff] }
 0x2fc   : > { %v2196_v16 = vpop.f32.mrb[3].mxu1 }
 0x2fd   : > { %1795 = vst [vmem:[#allocation3] sm:$0xff] %v1787_v18  ;;  %v1658_v36 = vadd.f32 %v2138_v27, %v1545_v52  ;;  %v2139_v43 = vpop.f32.mrb[2].mxu0  ;;  %v2197_v15 = vadd.f32 %v2196_v16, %v2195_v13  ;;  %v1552_v16 = vld [vmem:[#allocation2 + $0x38] sm:$0xff] }
 0x2fe   : > { %v2140_v62 = vpop.f32.mrb[3].mxu0 }
 0x2ff   : > { %1666 = vst [vmem:[#allocation2] sm:$0xff] %v1658_v36  ;;  %v1788_v46 = vadd.f32 %v2197_v15, %v1675_v5  ;;  %v2141_v49 = vadd.f32 %v2140_v62, %v2139_v43  ;;  %v2198_v3 = vpop.f32.mrb[4].mxu1 }
 0x300   : > { %v2199_v34 = vpop.f32.mrb[5].mxu1 }
 0x301   : > { %1796 = vst [vmem:[#allocation3 + $0x8] sm:$0xff] %v1788_v46  ;;  %v1659_v45 = vadd.f32 %v2141_v49, %v1546_v42  ;;  %v2142_v48 = vpop.f32.mrb[4].mxu0  ;;  %v2200_v37 = vadd.f32 %v2199_v34, %v2198_v3 }
 0x302   : > { %v2143_v57 = vpop.f32.mrb[5].mxu0 }
 0x303   : > { %1667 = vst [vmem:[#allocation2 + $0x8] sm:$0xff] %v1659_v45  ;;  %v1789_v50 = vadd.f32 %v2200_v37, %v1676_v56  ;;  %v2144_v40 = vadd.f32 %v2143_v57, %v2142_v48  ;;  %v2201_v6 = vpop.f32.mrb[6].mxu1 }
 0x304   : > { %v2202_v0 = vpop.f32.mrb[7].mxu1  ;;  %v1815_v62 = vld [vmem:[#allocation3] sm:$0xff] (!%p2094_p10) }
 0x305   : > { %1797 = vst [vmem:[#allocation3 + $0x10] sm:$0xff] %v1789_v50  ;;  %v1660_v28 = vadd.f32 %v2144_v40, %v1547_v35  ;;  %v2145_v60 = vpop.f32.mrb[6].mxu0  ;;  %v2203_v4 = vadd.f32 %v2202_v0, %v2201_v6  ;;  %2556 = vrcp.f32 (!%p2094_p10), %v1815_v62  ;;  %v2095_v50 = vld [vmem:[%s4067_s1] ss:$0 sm:$0xff] (!%p2094_p10) }
 0x306   : > { %v2146_v12 = vpop.f32.mrb[7].mxu0  ;;  %v1807_v37 = vld [vmem:[#allocation2] sm:$0xff] (!%p2094_p10) }
 0x307   : > { %1668 = vst [vmem:[#allocation2 + $0x10] sm:$0xff] %v1660_v28  ;;  %v1790_v58 = vadd.f32 %v2203_v4, %v1677_v24  ;;  %v2147_v8 = vadd.f32 %v2146_v12, %v2145_v60  ;;  %v2204_v51 = vpop.f32.mrb[8].mxu1 }
 0x308   : > { %v2205_v61 = vpop.f32.mrb[9].mxu1  ;;  %v1816_v46 = vld [vmem:[#allocation3 + $0x8] sm:$0xff] (!%p2094_p10) }
 0x309   : > { %1798 = vst [vmem:[#allocation3 + $0x18] sm:$0xff] %v1790_v58  ;;  %v1661_v10 = vadd.f32 %v2147_v8, %v1548_v41  ;;  %v2148_v23 = vpop.f32.mrb[8].mxu0  ;;  %v2206_v14 = vadd.f32 %v2205_v61, %v2204_v51  ;;  %2558 = vrcp.f32 (!%p2094_p10), %v1816_v46 }
 0x30a   : > { %v2149_v17 = vpop.f32.mrb[9].mxu0  ;;  %v1808_v35 = vld [vmem:[#allocation2 + $0x8] sm:$0xff] (!%p2094_p10) }
 0x30b   : > { %1669 = vst [vmem:[#allocation2 + $0x18] sm:$0xff] %v1661_v10  ;;  %v1791_v25 = vadd.f32 %v2206_v14, %v1678_v21  ;;  %v2150_v20 = vadd.f32 %v2149_v17, %v2148_v23  ;;  %v2207_v9 = vpop.f32.mrb[10].mxu1 }
 0x30c   : > { %v2208_v26 = vpop.f32.mrb[11].mxu1  ;;  %v1817_v49 = vld [vmem:[#allocation3 + $0x10] sm:$0xff] (!%p2094_p10) }
 0x30d   : > { %1799 = vst [vmem:[#allocation3 + $0x20] sm:$0xff] %v1791_v25  ;;  %v1662_v2 = vadd.f32 %v2150_v20, %v1549_v33  ;;  %v2151_v53 = vpop.f32.mrb[10].mxu0  ;;  %v2209_v44 = vadd.f32 %v2208_v26, %v2207_v9  ;;  %2560 = vrcp.f32 (!%p2094_p10), %v1817_v49 }
 0x30e   : > { %v2152_v54 = vpop.f32.mrb[11].mxu0  ;;  %v1809_v40 = vld [vmem:[#allocation2 + $0x10] sm:$0xff] (!%p2094_p10) }
 0x30f   : > { %1670 = vst [vmem:[#allocation2 + $0x20] sm:$0xff] %v1662_v2  ;;  %v1792_v47 = vadd.f32 %v2209_v44, %v1679_v22  ;;  %v2153_v30 = vadd.f32 %v2152_v54, %v2151_v53  ;;  %v2210_v38 = vpop.f32.mrb[12].mxu1  ;;  %v2557_v57 = vpop.eup (!%p2094_p10), %2556 }
 0x310   : > { %v2211_v39 = vpop.f32.mrb[13].mxu1  ;;  %v1818_v3 = vld [vmem:[#allocation3 + $0x18] sm:$0xff] (!%p2094_p10)  ;;  %v1824_v24 = vmul.f32 (!%p2094_p10), %v2557_v57, %v1807_v37 }
 0x311   : > { %1800 = vst [vmem:[#allocation3 + $0x28] sm:$0xff] %v1792_v47  ;;  %v1663_v32 = vadd.f32 %v2153_v30, %v1550_v31  ;;  %v2154_v29 = vpop.f32.mrb[12].mxu0  ;;  %v2212_v63 = vadd.f32 %v2211_v39, %v2210_v38  ;;  %2562 = vrcp.f32 (!%p2094_p10), %v1818_v3 }
 0x312   : > { %v2155_v19 = vpop.f32.mrb[13].mxu0  ;;  %v1810_v0 = vld [vmem:[#allocation2 + $0x18] sm:$0xff] (!%p2094_p10)  ;;  %v1846_v12 = vadd.f32 (!%p2094_p10), %v2095_v50, %v1824_v24 }
 0x313   : > { %1671 = vst [vmem:[#allocation2 + $0x28] sm:$0xff] %v1663_v32  ;;  %v1793_v11 = vadd.f32 %v2212_v63, %v1680_v59  ;;  %v2156_v55 = vadd.f32 %v2155_v19, %v2154_v29  ;;  %v2213_v52 = vpop.f32.mrb[14].mxu1  ;;  %v2559_v6 = vpop.eup (!%p2094_p10), %2558 }
 0x314   : > { %v2214_v18 = vpop.f32.mrb[15].mxu1  ;;  %v1819_v56 = vld [vmem:[#allocation3 + $0x20] sm:$0xff] (!%p2094_p10)  ;;  %v1826_v60 = vmul.f32 (!%p2094_p10), %v2559_v6, %v1808_v35  ;;  %1854 = vst [vmem:[%s3052_s10] sm:$0xff] (!%p2094_p10), %v1846_v12 }
 0x315   : > { %1801 = vst [vmem:[#allocation3 + $0x30] sm:$0xff] %v1793_v11  ;;  %v1664_v27 = vadd.f32 %v2156_v55, %v1551_v7  ;;  %v2157_v13 = vpop.f32.mrb[14].mxu0  ;;  %v2215_v5 = vadd.f32 %v2214_v18, %v2213_v52  ;;  %1806 = sbr.rel (%p2094_p10) target bundleno = 817 (0x331), region = 64  ;;  %2564 = vrcp.f32 (!%p2094_p10), %v1819_v56 }
 0x316   : > { %v2158_v36 = vpop.f32.mrb[15].mxu0  ;;  %v1811_v4 = vld [vmem:[#allocation2 + $0x20] sm:$0xff] (!%p2094_p10)  ;;  %v1847_v21 = vadd.f32 (!%p2094_p10), %v2095_v50, %v1826_v60 }
 0x317   : > { %1672 = vst [vmem:[#allocation2 + $0x30] sm:$0xff] %v1664_v27  ;;  %v1794_v43 = vadd.f32 %v2215_v5, %v1681_v1  ;;  %v2159_v15 = vadd.f32 %v2158_v36, %v2157_v13  ;;  %v2561_v28 = vpop.eup (!%p2094_p10), %2560 }
 0x318   : > { %v1820_v34 = vld [vmem:[#allocation3 + $0x28] sm:$0xff] (!%p2094_p10)  ;;  %v1828_v58 = vmul.f32 (!%p2094_p10), %v2561_v28, %v1809_v40  ;;  %1855 = vst [vmem:[%s3052_s10 + $0x8] sm:$0xff] (!%p2094_p10), %v1847_v21 }
 0x319   : > { %1802 = vst [vmem:[#allocation3 + $0x38] sm:$0xff] %v1794_v43  ;;  %v1665_v42 = vadd.f32 %v2159_v15, %v1552_v16  ;;  %2566 = vrcp.f32 (!%p2094_p10), %v1820_v34 }
 0x31a   : > { %v1812_v8 = vld [vmem:[#allocation2 + $0x28] sm:$0xff] (!%p2094_p10)  ;;  %v1848_v14 = vadd.f32 (!%p2094_p10), %v2095_v50, %v1828_v58 }
 0x31b   : > { %1673 = vst [vmem:[#allocation2 + $0x38] sm:$0xff] %v1665_v42  ;;  %v2563_v41 = vpop.eup (!%p2094_p10), %2562 }
 0x31c   : > { %v1821_v45 = vld [vmem:[#allocation3 + $0x30] sm:$0xff]  ;;  %v1830_v61 = vmul.f32 %v2563_v41, %v1810_v0  ;;  %1856 = vst [vmem:[%s3052_s10 + $0x10] sm:$0xff] %v1848_v14 }
 0x31d   : > { %2568 = vrcp.f32 %v1821_v45 }
 0x31e   : > { %v1813_v10 = vld [vmem:[#allocation2 + $0x30] sm:$0xff]  ;;  %v1849_v20 = vadd.f32 %v2095_v50, %v1830_v61 }
 0x31f   : > { %v2565_v51 = vpop.eup %2564 }
 0x320   : > { %v1822_v48 = vld [vmem:[#allocation3 + $0x38] sm:$0xff]  ;;  %v1832_v33 = vmul.f32 %v2565_v51, %v1811_v4  ;;  %1857 = vst [vmem:[%s3052_s10 + $0x18] sm:$0xff] %v1849_v20 }
 0x321   : > { %2570 = vrcp.f32 %v1822_v48 }
 0x322   : > { %v1814_v17 = vld [vmem:[#allocation2 + $0x38] sm:$0xff]  ;;  %v1850_v26 = vadd.f32 %v2095_v50, %v1832_v33 }
 0x323   : > { %v2567_v23 = vpop.eup %2566 }
 0x324   : > { %v1834_v9 = vmul.f32 %v2567_v23, %v1812_v8  ;;  %1858 = vst [vmem:[%s3052_s10 + $0x20] sm:$0xff] %v1850_v26 }
 0x326   : > { %v1851_v53 = vadd.f32 %v2095_v50, %v1834_v9 }
 0x327   : > { %v2569_v25 = vpop.eup %2568 }
 0x328   : > { %v1836_v2 = vmul.f32 %v2569_v25, %v1813_v10  ;;  %1859 = vst [vmem:[%s3052_s10 + $0x28] sm:$0xff] %v1851_v53 }
 0x32a   : > { %v1852_v31 = vadd.f32 %v2095_v50, %v1836_v2 }
 0x32b   : > { %v2571_v22 = vpop.eup %2570 }
 0x32c   : > { %v1838_v44 = vmul.f32 %v2571_v22, %v1814_v17  ;;  %1860 = vst [vmem:[%s3052_s10 + $0x30] sm:$0xff] %v1852_v31 }
 0x32e   : > { %v1853_v54 = vadd.f32 %v2095_v50, %v1838_v44 }
 0x330   : > { %1861 = vst [vmem:[%s3052_s10 + $0x38] sm:$0xff] %v1853_v54 }
 0x331 PF: > { %s2103_s16 = sshll.u32 %s2746_s8, 10  ;;  %s1876_s23 = sshll.u32 %s3052_s10, 4  ;;  %s4001_s23 = int_to_ptr.vmem [resolvable:$true] %s1876_s23 }
 0x332   : > { %s3998_s15 = scalar_lea.hbm %s4073_s7, %s2103_s16  ;;  %s4119_s20 = sand.u32 1, %s2722_s25  }
 0x333   : > { %s4005_s29 = scalar_lea.sflag [#allocation6], %s4119_s20  ;;  %s2632_s12 = scalar_lea.vmem %s4001_s23, 1024 }
 0x334   : > { %p2633_p11 = scmp.ne.s32.totalorder %s4001_s23, %s2632_s12  ;;  %p4120_p12 = scmp.ne.s32.totalorder %s4099_s27, 0 }
 0x335   : > { %s2767_s8 = smov [#allocation9]  }
 0x336   : > { %p2634_p2 = pnand %p2633_p11, %p4120_p12  ;;  %s2636_s14 = sshll.u32 %s2767_s8, 4  ;;  %s2637_s14 = int_to_ptr.vmem [resolvable:$false] %s2636_s14 }
 0x337   : > { %s2638_s13 = scalar_lea.vmem %s2637_s14, 2048  ;;  %p2639_p0 = scmp.lt.s32.totalorder %s4001_s23, %s2637_s14 }
 0x338   : > { %p2635_p13 = pneg %p2634_p2  ;;  %p2640_p5 = scmp.lt.s32.totalorder %s2638_s13, %s2632_s12 }
 0x33a   : > { %p2641_p7 = por %p2640_p5, %p2639_p0 }
 0x33c   : > { %p2642_p3 = pnand %p2641_p7, %p2635_p13 }
 0x33e   : > { %2645 = shalt.err (!%p2642_p3)
}
 0x33f   : > { %s2646_s22 = scalar_lea.hbm %s3998_s15, 1024  ;;  %s2650_s18 = scalar_lea.hbm %s4073_s7, 3072 }
 0x340   : > { %p2647_p8 = scmp.ne.s32.totalorder %s3998_s15, %s2646_s22  ;;  %p2651_p9 = scmp.lt.u32.totalorder %s3998_s15, %s4073_s7 }
 0x341   : > { %p2652_p1 = scmp.lt.u32.totalorder %s2650_s18, %s2646_s22  ;;  %p2654_p11 = scmp.lt.u32.totalorder %s2646_s22, %s3998_s15 }
 0x342   : > { %p2648_p4 = pnand %p2647_p8, %p4120_p12 }
 0x343   : > { %p2653_p10 = por %p2652_p1, %p2651_p9 }
 0x344   : > { %p2649_p6 = pneg %p2648_p4 }
 0x345   : > { %p2655_p2 = por %p2654_p11, %p2653_p10 }
 0x347   : > { %p2656_p13 = pnand %p2655_p2, %p2649_p6 }
 0x349   : > { %2659 = shalt.err (!%p2656_p13)
}
 0x34a   : > { %s2768_s9 = smov 128   ;;  %s2769_s30 = smov 8  }
 0x34b   : > { %2284 = dma.vmem_to_hbm [thread:$0]  (%p4120_p12), %s4001_s23, 1024, %s3998_s15, %s4005_s29, %s2768_s9, %s2768_s9, %s2769_s30  }
 0x34c PF: > { %s4121_s26 = sld [smem:[#allocation21_spill]]  ;;  %p2298_p0 = scmp.ge.s32.totalorder %s2758_s11, 2 }
 0x34d   : > { %s1891_s16 = sand.u32 1, %s2718_s24  }
 0x34e   : > { %s1892_s3 = scalar_lea.sflag [#allocation6], %s1891_s16 }
 0x352   : > { %p4122_p5 = scmp.ne.s32.totalorder %s4121_s26, 0 }
 0x354   : > { %p2294_p7 = pnand %p2298_p0, %p4122_p5 }
 0x356   : > { %2713 = dma.done.wait (!%p2294_p7), %s1892_s3, 1024  }
 0x357   : > { %2715 = vsyncadd (!%p2294_p7), %s1892_s3, 4294966272  ;;  %s26_s11 = sadd.s32 1, %s2758_s11   ;;  %s4123_s17 = sld [smem:[#allocation13_spill]] }
 0x358   : > { %p23_p3 = scmp.ge.s32.totalorder %s26_s11, 14   ;;  %s4124_s26 = sld [smem:[#allocation20_spill]] }
 0x359   : > { %s4125_s20 = sld [smem:[#allocation14_spill]]  ;;  %s4126_s29 = sld [smem:[#allocation19_spill]] }
 0x35a   : > { %s4127_s30 = sld [smem:[#allocation15_spill]]  ;;  %s4128_s8 = sld [smem:[#allocation16_spill]] }
 0x35b   : > { %s4129_s9 = sld [smem:[#allocation17_spill]]  ;;  %s4130_s10 = sld [smem:[#allocation18_spill]] }
 0x35c   : > { %s4131_s24 = smov %s2722_s25  ;;  %s4133_s27 = smov %s2734_s28 }
 0x35d   : > { %s4132_s25 = smov %s4123_s17  ;;  %25 = sbr.rel (!%p23_p3) target bundleno = 14 (0xe), region = 126 }
 0x35f   : > { %s4134_s28 = smov %s4125_s20 }
 0x364   :  { %1897 = vsyncpa [#allocation5], 1 }
 0x365   :  { %1899 = vsyncpa [#allocation5 + $0x1], 1 }
 0x366   :  { %1900 = vsyncpa [#allocation8], 1 }
 0x367   :  { %1902 = vsyncpa [#allocation8 + $0x1], 1 }
 0x368   :  { %1903 = vsyncpa [#allocation6], 1 }
 0x369   :  { %1905 = vsyncpa [#allocation6 + $0x1], 1 }

</bundles_post_ra>
